<compile_context>
chip_gen: v6e
topology: v6e:2x2x1
jax: 0.10.0
libtpu: 0.0.40
codegen_flags: <defaults>
</compile_context>

<pallas_src>
import numpy as np

import jax
import jax.numpy as jnp
from jax.experimental import pallas as pl
from jax.experimental.pallas import tpu as pltpu


# ----------------------------- small helpers ---------------------------------
def _round_up(x, mult):
    return ((x + mult - 1) // mult) * mult


def _device_kind():
    try:
        return jax.devices()[0].device_kind.lower()
    except Exception:
        return ""


def _vmem_budget_bytes(kind):
    if "v7" in kind:
        return 48 * 1024 * 1024          # v7x: 64 MiB physical per TensorCore
    if any(t in kind for t in ("v4", "v5", "v6")):
        return 100 * 1024 * 1024         # 128 MiB physical
    return 64 * 1024 * 1024              # unknown chip: conservative


def _supports_bf16_valu(kind):
    # v5e-class and older chips have no bf16 VALU -> keep elementwise math f32.
    return not any(t in kind for t in ("v2", "v3", "v4", "v5"))


def _vmem_estimate(b_tile, i_chunk, d, m, din, h1, h2, f1, fout,
                   in_bytes, mm_bytes, ew_bytes):
    """Rough per-grid-step VMEM footprint (bytes)."""
    R = b_tile * d * m
    G = b_tile * d
    ci = max(1, min(i_chunk, m))
    est = 0
    est += 2 * R * din * in_bytes                      # x tile (double-buffered)
    if mm_bytes != in_bytes:
        est += R * din * mm_bytes                      # operand cast of x
    est += R * 2 * h1 * 4                              # fused layer-1 result (f32)
    est += R * 2 * h1 * ew_bytes                       # top / bottom halves
    est += G * ci * m * h1 * ew_bytes                  # pair activation slab h
    if mm_bytes != ew_bytes:
        est += G * ci * m * h1 * mm_bytes              # matmul-operand cast of h
    est += G * ci * m * h2 * 4                         # layer-2 result (f32 accum)
    est += G * (2 * h2 + f1 + fout) * 4                # p, q, y
    est += (din * 2 * h1 + h1 * h2 + h2 * f1 + f1 * fout) * mm_bytes  # weights x1
    est += (2 * h1 + h2 + f1 + fout) * 4               # biases
    est += 2 * b_tile * fout * 4                       # out block (double-buffered)
    return est


def _choose_tiling(b, d, m, din, h1, h2, f1, fout, in_bytes, mm_bytes, ew_bytes,
                   budget, is_v7x, b_tile=None, pair_chunk=None):
    """Pick (batch_tile, pair_i_chunk) so the per-step footprint fits ~60% of VMEM."""
    target = int(budget * 0.6)

    def fits(bt, ci):
        return _vmem_estimate(bt, ci, d, m, din, h1, h2, f1, fout,
                              in_bytes, mm_bytes, ew_bytes) <= target

    ci_cands = ([pair_chunk] if pair_chunk is not None else
                [m] + [c for c in (512, 256, 128, 64, 32, 16, 8, 4, 2, 1) if c < m])

    if b_tile is not None:
        for ci in ci_cands:
            if fits(b_tile, ci):
                return b_tile, ci
        return b_tile, ci_cands[-1]

    if b <= 8:
        bt_cands = [b]                    # single step; block == full batch dim
    else:
        bt_cands = []
        if not (is_v7x and b >= 16):
            bt_cands.append(b)            # single step if it fits
        top = min(_round_up(b, 8), 128)
        if is_v7x and b >= 16:
            # keep >= 2 "parallel" grid steps so both TensorCores get work
            top = max(8, ((_round_up(b, 8) // 2) // 8) * 8)
        t = (top // 8) * 8
        while t >= 8:
            if t not in bt_cands:
                bt_cands.append(t)
            if t == 8:
                break
            t = max(8, ((t // 2 + 7) // 8) * 8)

    for bt in bt_cands:
        for ci in ci_cands:
            if fits(bt, ci):
                return bt, ci
    return bt_cands[-1], ci_cands[-1]     # best effort (smallest footprint tried)


# ------------------------------ main wrapper ----------------------------------
def boosted_point_pair_net2(X, params, boost_factor, *,
                            compute_dtype=jnp.float32,
                            elementwise_dtype=None,
                            b_tile=None, pair_chunk=None):
    """Forward pass of BoostedPointPairNet2.

    X: (b, n, din) float32.  params: (w1, b1, w2, b2, w3, b3, w4, b4) with
    weights stored (din, dout) and biases (1, dout).  Returns (b, FC_dims[-1]).
    """
    w1, b1, w2, b2, w3, b3, w4, b4 = params
    b, n, din = X.shape
    d = int(boost_factor)
    m = n // d
    assert m * d == n
    h1, h2 = w1.shape[1], w2.shape[1]
    f1, fout = w3.shape[1], w4.shape[1]
    assert w1.shape[0] == 2 * din and w3.shape[0] == h2 and w4.shape[0] == f1

    kind = _device_kind()
    mm_dtype = np.dtype(compute_dtype)
    if elementwise_dtype is None:
        # bf16 broadcast-add/relu only where the VPU has bf16 VALU (v6e/v7x).
        ew_dtype = (mm_dtype if (mm_dtype == np.dtype(jnp.bfloat16)
                                 and _supports_bf16_valu(kind))
                    else np.dtype(jnp.float32))
    else:
        ew_dtype = np.dtype(elementwise_dtype)

    budget = _vmem_budget_bytes(kind)
    bt, ci = _choose_tiling(b, d, m, din, h1, h2, f1, fout,
                            X.dtype.itemsize, mm_dtype.itemsize, ew_dtype.itemsize,
                            budget, is_v7x=("v7" in kind),
                            b_tile=b_tile, pair_chunk=pair_chunk)
    ci = max(1, min(ci, m))

    b_pad = _round_up(b, bt)
    n_tiles = b_pad // bt

    # Fused layer-1 weight: [w1_top | w1_bot] -> ONE (rows, din) @ (din, 2*H1)
    # matmul in the kernel; the O(m^2) pair concat is never materialized.
    w1_cat = jnp.concatenate([w1[:din], w1[din:]], axis=1).astype(mm_dtype)
    weights = (w1_cat, b1.astype(jnp.float32),
               w2.astype(mm_dtype), b2.astype(jnp.float32),
               w3.astype(mm_dtype), b3.astype(jnp.float32),
               w4.astype(mm_dtype), b4.astype(jnp.float32))

    # X pre-flattened to (b_pad*n, din): rows are the sublane axis, so layer 1
    # consumes the DMA'd block directly (no in-kernel 4-D reshape/relayout).
    Xf = X.reshape(b * n, din)
    if b_pad != b:
        Xf = jnp.concatenate(
            [Xf, jnp.zeros(((b_pad - b) * n, din), X.dtype)], axis=0)

    def kernel(x_ref, w1c_ref, b1_ref, w2_ref, b2_ref, w3_ref, b3_ref,
               w4_ref, b4_ref, out_ref):
        G = bt * d                                              # boost groups in tile
        xflat = x_ref[...].astype(mm_dtype)                     # (bt*d*m, din)

        # ---- MLP L, layer 1 (fused): one matmul, split top/bottom halves.
        xw = jnp.dot(xflat, w1c_ref[...],
                     preferred_element_type=jnp.float32)        # (bt*d*m, 2*H1)
        xw_top = (xw[:, :h1] + b1_ref[...]).astype(ew_dtype)    # acts on x[j]; bias once
        xw_bot = xw[:, h1:].astype(ew_dtype)                    # acts on x[i]

        top4 = xw_top.reshape(G, 1, m, h1)
        bot3 = xw_bot.reshape(G, m, h1)
        w2v, b2v = w2_ref[...], b2_ref[...]

        # ---- pair broadcast-add + ReLU, layer 2, SymPool(max), chunked over the
        # pair i-axis so the (G, ci, m, H1/H2) slabs stay inside the VMEM budget.
        # TODO(synk): switch this static chunk loop to lax.fori_loop for very
        # large chunk counts (the static loop does not bound live ranges).
        p = None
        for i0 in range(0, m, ci):
            cc = min(ci, m - i0)
            bot_c = bot3[:, i0:i0 + cc, :].reshape(G, cc, 1, h1)
            h = jnp.maximum(top4 + bot_c, 0).astype(mm_dtype)    # (G, cc, m, H1)
            g2 = jnp.dot(h.reshape(G * cc * m, h1), w2v,
                         preferred_element_type=jnp.float32) + b2v
            part = jnp.max(g2.reshape(G, cc * m, h2), axis=1)    # running SymPool max
            p = part if p is None else jnp.maximum(p, part)      # (G, H2) f32

        # ---- MLP F (Linear -> ReLU -> Linear), batched over all boost groups.
        q = jnp.dot(p.astype(mm_dtype), w3_ref[...],
                    preferred_element_type=jnp.float32) + b3_ref[...]
        q = jnp.maximum(q, 0.0)
        y = jnp.dot(q.astype(mm_dtype), w4_ref[...],
                    preferred_element_type=jnp.float32) + b4_ref[...]   # (G, Fout)

        # ---- BoostPool: max over the d boost groups; single aligned store.
        out_ref[...] = jnp.max(y.reshape(bt, d, fout), axis=1).astype(out_ref.dtype)

    x_spec = pl.BlockSpec((bt * n, din), lambda bi: (bi, 0))
    out_spec = pl.BlockSpec((bt, fout), lambda bi: (bi, 0))

    def _w_spec(a, single_buffer):
        nd = a.ndim
        if single_buffer:
            # Constant index_map -> the weights never need double-buffering.
            return pl.BlockSpec(a.shape, lambda bi, _nd=nd: (0,) * _nd,
                                pipeline_mode=pl.Buffered(1))
        return pl.BlockSpec(a.shape, lambda bi, _nd=nd: (0,) * _nd)

    flops = (2 * b_pad * d * m * (2 * din * h1 + m * h1 * h2)
             + 2 * b_pad * d * (h2 * f1 + f1 * fout))
    bytes_accessed = (Xf.size * Xf.dtype.itemsize
                      + sum(int(w.size) * w.dtype.itemsize for w in weights)
                      + b_pad * fout * 4)

    def _build(single_buffer_weights):
        return pl.pallas_call(
            kernel,
            out_shape=jax.ShapeDtypeStruct((b_pad, fout), jnp.float32),
            grid_spec=pltpu.PrefetchScalarGridSpec(
                num_scalar_prefetch=0,
                grid=(n_tiles,),
                in_specs=[x_spec] + [_w_spec(w, single_buffer_weights)
                                     for w in weights],
                out_specs=out_spec,
            ),
            compiler_params=pltpu.CompilerParams(
                dimension_semantics=("parallel",),
                vmem_limit_bytes=int(budget)),
            cost_estimate=pl.CostEstimate(flops=int(flops), transcendentals=0,
                                          bytes_accessed=int(bytes_accessed)),
        )

    try:
        out = _build(True)(Xf, *weights)
    except Exception:
        # Fallback if single-buffered (pl.Buffered(1)) weight specs are rejected.
        out = _build(False)(Xf, *weights)

    return out[:b] if b_pad != b else out


# ---------------- deterministic parameter init (mirrors get_and_init_FC_layer) -
def init_linear(key, din_, dout_):
    # xavier_uniform with gain = calculate_gain('relu') = sqrt(2); bias = 0
    gain = 2.0 ** 0.5
    bound = gain * (6.0 / (din_ + dout_)) ** 0.5
    w = jax.random.uniform(key, (din_, dout_), jnp.float32, -bound, bound)
    bias = jnp.zeros((1, dout_), jnp.float32)
    return w, bias


# ---------------- pure-JAX reference of the torch forward (for verification) ---
def reference(X, params, d):
    w1, b1, w2, b2, w3, b3, w4, b4 = params
    b_, n, din = X.shape
    m = n // d
    Xv = X.reshape(b_, d, m, din)
    xr = jnp.broadcast_to(Xv[:, :, None, :, :], (b_, d, m, m, din))   # Xr
    xrt = jnp.broadcast_to(Xv[:, :, :, None, :], (b_, d, m, m, din))  # Xr.transpose(2,3)
    xrc = jnp.concatenate([xr, xrt], axis=-1)
    g = jnp.maximum(xrc @ w1 + b1[0], 0.0) @ w2 + b2[0]
    p = jnp.max(g, axis=(2, 3))                                       # SymPool (max)
    y = jnp.maximum(p @ w3 + b3[0], 0.0) @ w4 + b4[0]
    return jnp.max(y, axis=1)                                         # BoostPool (max)


if __name__ == "__main__":
    key = jax.random.PRNGKey(0)

    # small shapes consistent with the module
    b, n, din = 2, 8, 4
    boost_factor = 2                       # d = 2, m = n/d = 4
    dims = [2 * din, 32, 32]               # MLP L  (dims[0] must be 2*din)
    FC_dims = [32, 32, 16]                 # MLP F  (FC_dims[0] == dims[-1])

    kx, k1, k2, k3, k4 = jax.random.split(key, 5)
    X = jax.random.normal(kx, (b, n, din), jnp.float32)

    w1, b1 = init_linear(k1, dims[0], dims[1])
    w2, b2 = init_linear(k2, dims[1], dims[2])
    w3, b3 = init_linear(k3, FC_dims[0], FC_dims[1])
    w4, b4 = init_linear(k4, FC_dims[1], FC_dims[2])
    params = (w1, b1, w2, b2, w3, b3, w4, b4)

    ref = reference(X, params, boost_factor)

    # 1) f32 path (single grid step): exact match vs reference forward.
    out = jax.block_until_ready(boosted_point_pair_net2(X, params, boost_factor))
    assert out.shape == (b, FC_dims[-1])
    assert jnp.allclose(out, ref, rtol=1e-4, atol=1e-4)

    # 2) f32 path with the pair i-axis chunked (the large-m / v7x VMEM path).
    out_c = jax.block_until_ready(
        boosted_point_pair_net2(X, params, boost_factor, pair_chunk=2))
    assert jnp.allclose(out_c, ref, rtol=1e-4, atol=1e-4)

    # 3) multi-tile batch path: multiple-of-8 batch tile + host-side padding.
    bb = 20
    X2 = jax.random.normal(jax.random.fold_in(kx, 7), (bb, n, din), jnp.float32)
    ref2 = reference(X2, params, boost_factor)
    out2 = jax.block_until_ready(
        boosted_point_pair_net2(X2, params, boost_factor, b_tile=8))
    assert out2.shape == (bb, FC_dims[-1])
    assert jnp.allclose(out2, ref2, rtol=1e-4, atol=1e-4)

    # 4) bf16 MXU-operand path (bf16 elementwise only where the VPU supports it),
    #    checked against the f32 reference at a bf16-level tolerance.
    out_bf = jax.block_until_ready(
        boosted_point_pair_net2(X, params, boost_factor,
                                compute_dtype=jnp.bfloat16))
    assert out_bf.shape == (b, FC_dims[-1])
    assert bool(jnp.all(jnp.isfinite(out_bf)))
    assert jnp.allclose(out_bf.astype(jnp.float32), ref, rtol=0.1, atol=0.1)

    print("KERNEL_OK")
</pallas_src>

<mosaic_0001>
module attributes {stable_mosaic.version = 11 : i64} {
  func.func @kernel(%arg0: i32, %arg1: memref<16x4xf32, #tpu.memory_space<vmem>>, %arg2: memref<4x64xf32, #tpu.memory_space<vmem>>, %arg3: memref<1x32xf32, #tpu.memory_space<vmem>>, %arg4: memref<32x32xf32, #tpu.memory_space<vmem>>, %arg5: memref<1x32xf32, #tpu.memory_space<vmem>>, %arg6: memref<32x32xf32, #tpu.memory_space<vmem>>, %arg7: memref<1x32xf32, #tpu.memory_space<vmem>>, %arg8: memref<32x16xf32, #tpu.memory_space<vmem>>, %arg9: memref<1x16xf32, #tpu.memory_space<vmem>>, %arg10: memref<2x16xf32, #tpu.memory_space<vmem>>) attributes {dimension_semantics = [#tpu.dimension_semantics<parallel>], iteration_bounds = array<i64: 1>, scalar_prefetch = 0 : i64, scratch_operands = 0 : i64, tpu.core_type = #tpu.core_type<tc>, window_params = [{transform_indices = @transform_0, window_bounds = array<i64: 16, 4>}, {pipeline_mode = #tpu.pipeline_mode<synchronous>, transform_indices = @transform_1, window_bounds = array<i64: 4, 64>}, {pipeline_mode = #tpu.pipeline_mode<synchronous>, transform_indices = @transform_2, window_bounds = array<i64: 1, 32>}, {pipeline_mode = #tpu.pipeline_mode<synchronous>, transform_indices = @transform_3, window_bounds = array<i64: 32, 32>}, {pipeline_mode = #tpu.pipeline_mode<synchronous>, transform_indices = @transform_4, window_bounds = array<i64: 1, 32>}, {pipeline_mode = #tpu.pipeline_mode<synchronous>, transform_indices = @transform_5, window_bounds = array<i64: 32, 32>}, {pipeline_mode = #tpu.pipeline_mode<synchronous>, transform_indices = @transform_6, window_bounds = array<i64: 1, 32>}, {pipeline_mode = #tpu.pipeline_mode<synchronous>, transform_indices = @transform_7, window_bounds = array<i64: 32, 16>}, {pipeline_mode = #tpu.pipeline_mode<synchronous>, transform_indices = @transform_8, window_bounds = array<i64: 1, 16>}, {transform_indices = @transform_9, window_bounds = array<i64: 2, 16>}]} {
    %c0 = arith.constant 0 : index
    %c0_0 = arith.constant 0 : index
    %0 = vector.load %arg1[%c0, %c0_0] : memref<16x4xf32, #tpu.memory_space<vmem>>, vector<16x4xf32>
    %c0_1 = arith.constant 0 : index
    %c0_2 = arith.constant 0 : index
    %1 = vector.load %arg2[%c0_1, %c0_2] : memref<4x64xf32, #tpu.memory_space<vmem>>, vector<4x64xf32>
    %cst = arith.constant dense<0.000000e+00> : vector<16x64xf32>
    %2 = tpu.matmul %0, %1, %cst {dimension_numbers = #tpu.dot_dimension_numbers<[1], [0], [0], [1], [0, 0, 1, 1], [], []>} : vector<16x4xf32>, vector<4x64xf32>, vector<16x64xf32> -> vector<16x64xf32>
    %3 = vector.extract_strided_slice %2 {offsets = [0, 0], sizes = [16, 32], strides = [1, 1]} : vector<16x64xf32> to vector<16x32xf32>
    %c0_3 = arith.constant 0 : index
    %c0_4 = arith.constant 0 : index
    %4 = vector.load %arg3[%c0_3, %c0_4] : memref<1x32xf32, #tpu.memory_space<vmem>>, vector<1x32xf32>
    %5 = vector.broadcast %4 : vector<1x32xf32> to vector<16x32xf32>
    %6 = arith.addf %3, %5 : vector<16x32xf32>
    %7 = vector.extract_strided_slice %2 {offsets = [0, 32], sizes = [16, 32], strides = [1, 1]} : vector<16x64xf32> to vector<16x32xf32>
    %8 = vector.shape_cast %6 : vector<16x32xf32> to vector<4x1x4x32xf32>
    %9 = vector.shape_cast %7 : vector<16x32xf32> to vector<4x4x32xf32>
    %c0_5 = arith.constant 0 : index
    %c0_6 = arith.constant 0 : index
    %10 = vector.load %arg4[%c0_5, %c0_6] : memref<32x32xf32, #tpu.memory_space<vmem>>, vector<32x32xf32>
    %c0_7 = arith.constant 0 : index
    %c0_8 = arith.constant 0 : index
    %11 = vector.load %arg5[%c0_7, %c0_8] : memref<1x32xf32, #tpu.memory_space<vmem>>, vector<1x32xf32>
    %12 = vector.shape_cast %9 : vector<4x4x32xf32> to vector<4x4x1x32xf32>
    %13 = vector.broadcast %8 : vector<4x1x4x32xf32> to vector<4x4x4x32xf32>
    %14 = vector.broadcast %12 : vector<4x4x1x32xf32> to vector<4x4x4x32xf32>
    %15 = arith.addf %13, %14 : vector<4x4x4x32xf32>
    %cst_9 = arith.constant 0.000000e+00 : f32
    %16 = vector.broadcast %cst_9 : f32 to vector<4x4x4x32xf32>
    %17 = arith.maximumf %15, %16 : vector<4x4x4x32xf32>
    %18 = vector.shape_cast %17 : vector<4x4x4x32xf32> to vector<64x32xf32>
    %cst_10 = arith.constant dense<0.000000e+00> : vector<64x32xf32>
    %19 = tpu.matmul %18, %10, %cst_10 {dimension_numbers = #tpu.dot_dimension_numbers<[1], [0], [0], [1], [0, 0, 1, 1], [], []>} : vector<64x32xf32>, vector<32x32xf32>, vector<64x32xf32> -> vector<64x32xf32>
    %20 = vector.broadcast %11 : vector<1x32xf32> to vector<64x32xf32>
    %21 = arith.addf %19, %20 : vector<64x32xf32>
    %22 = vector.shape_cast %21 : vector<64x32xf32> to vector<4x16x32xf32>
    %cst_11 = arith.constant dense<0xFF800000> : vector<4x32xf32>
    %23 = vector.multi_reduction <maximumf>, %22, %cst_11 [1] : vector<4x16x32xf32> to vector<4x32xf32>
    %c0_12 = arith.constant 0 : index
    %c0_13 = arith.constant 0 : index
    %24 = vector.load %arg6[%c0_12, %c0_13] : memref<32x32xf32, #tpu.memory_space<vmem>>, vector<32x32xf32>
    %cst_14 = arith.constant dense<0.000000e+00> : vector<4x32xf32>
    %25 = tpu.matmul %23, %24, %cst_14 {dimension_numbers = #tpu.dot_dimension_numbers<[1], [0], [0], [1], [0, 0, 1, 1], [], []>} : vector<4x32xf32>, vector<32x32xf32>, vector<4x32xf32> -> vector<4x32xf32>
    %c0_15 = arith.constant 0 : index
    %c0_16 = arith.constant 0 : index
    %26 = vector.load %arg7[%c0_15, %c0_16] : memref<1x32xf32, #tpu.memory_space<vmem>>, vector<1x32xf32>
    %27 = vector.broadcast %26 : vector<1x32xf32> to vector<4x32xf32>
    %28 = arith.addf %25, %27 : vector<4x32xf32>
    %cst_17 = arith.constant 0.000000e+00 : f32
    %29 = vector.broadcast %cst_17 : f32 to vector<4x32xf32>
    %30 = arith.maximumf %28, %29 : vector<4x32xf32>
    %c0_18 = arith.constant 0 : index
    %c0_19 = arith.constant 0 : index
    %31 = vector.load %arg8[%c0_18, %c0_19] : memref<32x16xf32, #tpu.memory_space<vmem>>, vector<32x16xf32>
    %cst_20 = arith.constant dense<0.000000e+00> : vector<4x16xf32>
    %32 = tpu.matmul %30, %31, %cst_20 {dimension_numbers = #tpu.dot_dimension_numbers<[1], [0], [0], [1], [0, 0, 1, 1], [], []>} : vector<4x32xf32>, vector<32x16xf32>, vector<4x16xf32> -> vector<4x16xf32>
    %c0_21 = arith.constant 0 : index
    %c0_22 = arith.constant 0 : index
    %33 = vector.load %arg9[%c0_21, %c0_22] : memref<1x16xf32, #tpu.memory_space<vmem>>, vector<1x16xf32>
    %34 = vector.broadcast %33 : vector<1x16xf32> to vector<4x16xf32>
    %35 = arith.addf %32, %34 : vector<4x16xf32>
    %36 = vector.shape_cast %35 : vector<4x16xf32> to vector<2x2x16xf32>
    %cst_23 = arith.constant dense<0xFF800000> : vector<2x16xf32>
    %37 = vector.multi_reduction <maximumf>, %36, %cst_23 [1] : vector<2x2x16xf32> to vector<2x16xf32>
    %c0_24 = arith.constant 0 : index
    %c0_25 = arith.constant 0 : index
    %38 = vector.load %arg10[%c0_24, %c0_25] : memref<2x16xf32, #tpu.memory_space<vmem>>, vector<2x16xf32>
    tpu.vector_store %arg10[%c0_24, %c0_25], %37 {strides = array<i32>} : memref<2x16xf32, #tpu.memory_space<vmem>>, vector<2x16xf32>,
    return
  }
  func.func @transform_0(%arg0: i32) -> (i32, i32) {
    %c0_i32 = arith.constant 0 : i32
    %c0_i32_0 = arith.constant 0 : i32
    return %arg0, %c0_i32 : i32, i32
  }
  func.func @transform_1(%arg0: i32) -> (i32, i32) {
    %c0_i32 = arith.constant 0 : i32
    %c0_i32_0 = arith.constant 0 : i32
    %c0_i32_1 = arith.constant 0 : i32
    return %c0_i32, %c0_i32_0 : i32, i32
  }
  func.func @transform_2(%arg0: i32) -> (i32, i32) {
    %c0_i32 = arith.constant 0 : i32
    %c0_i32_0 = arith.constant 0 : i32
    %c0_i32_1 = arith.constant 0 : i32
    return %c0_i32, %c0_i32_0 : i32, i32
  }
  func.func @transform_3(%arg0: i32) -> (i32, i32) {
    %c0_i32 = arith.constant 0 : i32
    %c0_i32_0 = arith.constant 0 : i32
    %c0_i32_1 = arith.constant 0 : i32
    return %c0_i32, %c0_i32_0 : i32, i32
  }
  func.func @transform_4(%arg0: i32) -> (i32, i32) {
    %c0_i32 = arith.constant 0 : i32
    %c0_i32_0 = arith.constant 0 : i32
    %c0_i32_1 = arith.constant 0 : i32
    return %c0_i32, %c0_i32_0 : i32, i32
  }
  func.func @transform_5(%arg0: i32) -> (i32, i32) {
    %c0_i32 = arith.constant 0 : i32
    %c0_i32_0 = arith.constant 0 : i32
    %c0_i32_1 = arith.constant 0 : i32
    return %c0_i32, %c0_i32_0 : i32, i32
  }
  func.func @transform_6(%arg0: i32) -> (i32, i32) {
    %c0_i32 = arith.constant 0 : i32
    %c0_i32_0 = arith.constant 0 : i32
    %c0_i32_1 = arith.constant 0 : i32
    return %c0_i32, %c0_i32_0 : i32, i32
  }
  func.func @transform_7(%arg0: i32) -> (i32, i32) {
    %c0_i32 = arith.constant 0 : i32
    %c0_i32_0 = arith.constant 0 : i32
    %c0_i32_1 = arith.constant 0 : i32
    return %c0_i32, %c0_i32_0 : i32, i32
  }
  func.func @transform_8(%arg0: i32) -> (i32, i32) {
    %c0_i32 = arith.constant 0 : i32
    %c0_i32_0 = arith.constant 0 : i32
    %c0_i32_1 = arith.constant 0 : i32
    return %c0_i32, %c0_i32_0 : i32, i32
  }
  func.func @transform_9(%arg0: i32) -> (i32, i32) {
    %c0_i32 = arith.constant 0 : i32
    %c0_i32_0 = arith.constant 0 : i32
    return %arg0, %c0_i32 : i32, i32
  }
}

module attributes {stable_mosaic.version = 11 : i64} {
  func.func @kernel(%arg0: i32, %arg1: memref<16x4xf32, #tpu.memory_space<vmem>>, %arg2: memref<4x64xf32, #tpu.memory_space<vmem>>, %arg3: memref<1x32xf32, #tpu.memory_space<vmem>>, %arg4: memref<32x32xf32, #tpu.memory_space<vmem>>, %arg5: memref<1x32xf32, #tpu.memory_space<vmem>>, %arg6: memref<32x32xf32, #tpu.memory_space<vmem>>, %arg7: memref<1x32xf32, #tpu.memory_space<vmem>>, %arg8: memref<32x16xf32, #tpu.memory_space<vmem>>, %arg9: memref<1x16xf32, #tpu.memory_space<vmem>>, %arg10: memref<2x16xf32, #tpu.memory_space<vmem>>) attributes {dimension_semantics = [#tpu.dimension_semantics<parallel>], iteration_bounds = array<i64: 1>, scalar_prefetch = 0 : i64, scratch_operands = 0 : i64, tpu.core_type = #tpu.core_type<tc>, window_params = [{transform_indices = @transform_0, window_bounds = array<i64: 16, 4>}, {pipeline_mode = #tpu.pipeline_mode<synchronous>, transform_indices = @transform_1, window_bounds = array<i64: 4, 64>}, {pipeline_mode = #tpu.pipeline_mode<synchronous>, transform_indices = @transform_2, window_bounds = array<i64: 1, 32>}, {pipeline_mode = #tpu.pipeline_mode<synchronous>, transform_indices = @transform_3, window_bounds = array<i64: 32, 32>}, {pipeline_mode = #tpu.pipeline_mode<synchronous>, transform_indices = @transform_4, window_bounds = array<i64: 1, 32>}, {pipeline_mode = #tpu.pipeline_mode<synchronous>, transform_indices = @transform_5, window_bounds = array<i64: 32, 32>}, {pipeline_mode = #tpu.pipeline_mode<synchronous>, transform_indices = @transform_6, window_bounds = array<i64: 1, 32>}, {pipeline_mode = #tpu.pipeline_mode<synchronous>, transform_indices = @transform_7, window_bounds = array<i64: 32, 16>}, {pipeline_mode = #tpu.pipeline_mode<synchronous>, transform_indices = @transform_8, window_bounds = array<i64: 1, 16>}, {transform_indices = @transform_9, window_bounds = array<i64: 2, 16>}]} {
    %c0 = arith.constant 0 : index
    %c0_0 = arith.constant 0 : index
    %0 = vector.load %arg1[%c0, %c0_0] : memref<16x4xf32, #tpu.memory_space<vmem>>, vector<16x4xf32>
    %c0_1 = arith.constant 0 : index
    %c0_2 = arith.constant 0 : index
    %1 = vector.load %arg2[%c0_1, %c0_2] : memref<4x64xf32, #tpu.memory_space<vmem>>, vector<4x64xf32>
    %cst = arith.constant dense<0.000000e+00> : vector<16x64xf32>
    %2 = tpu.matmul %0, %1, %cst {dimension_numbers = #tpu.dot_dimension_numbers<[1], [0], [0], [1], [0, 0, 1, 1], [], []>} : vector<16x4xf32>, vector<4x64xf32>, vector<16x64xf32> -> vector<16x64xf32>
    %3 = vector.extract_strided_slice %2 {offsets = [0, 0], sizes = [16, 32], strides = [1, 1]} : vector<16x64xf32> to vector<16x32xf32>
    %c0_3 = arith.constant 0 : index
    %c0_4 = arith.constant 0 : index
    %4 = vector.load %arg3[%c0_3, %c0_4] : memref<1x32xf32, #tpu.memory_space<vmem>>, vector<1x32xf32>
    %5 = vector.broadcast %4 : vector<1x32xf32> to vector<16x32xf32>
    %6 = arith.addf %3, %5 : vector<16x32xf32>
    %7 = vector.extract_strided_slice %2 {offsets = [0, 32], sizes = [16, 32], strides = [1, 1]} : vector<16x64xf32> to vector<16x32xf32>
    %8 = vector.shape_cast %6 : vector<16x32xf32> to vector<4x1x4x32xf32>
    %9 = vector.shape_cast %7 : vector<16x32xf32> to vector<4x4x32xf32>
    %c0_5 = arith.constant 0 : index
    %c0_6 = arith.constant 0 : index
    %10 = vector.load %arg4[%c0_5, %c0_6] : memref<32x32xf32, #tpu.memory_space<vmem>>, vector<32x32xf32>
    %c0_7 = arith.constant 0 : index
    %c0_8 = arith.constant 0 : index
    %11 = vector.load %arg5[%c0_7, %c0_8] : memref<1x32xf32, #tpu.memory_space<vmem>>, vector<1x32xf32>
    %12 = vector.shape_cast %9 : vector<4x4x32xf32> to vector<4x4x1x32xf32>
    %13 = vector.broadcast %8 : vector<4x1x4x32xf32> to vector<4x4x4x32xf32>
    %14 = vector.broadcast %12 : vector<4x4x1x32xf32> to vector<4x4x4x32xf32>
    %15 = arith.addf %13, %14 : vector<4x4x4x32xf32>
    %cst_9 = arith.constant 0.000000e+00 : f32
    %16 = vector.broadcast %cst_9 : f32 to vector<4x4x4x32xf32>
    %17 = arith.maximumf %15, %16 : vector<4x4x4x32xf32>
    %18 = vector.shape_cast %17 : vector<4x4x4x32xf32> to vector<64x32xf32>
    %cst_10 = arith.constant dense<0.000000e+00> : vector<64x32xf32>
    %19 = tpu.matmul %18, %10, %cst_10 {dimension_numbers = #tpu.dot_dimension_numbers<[1], [0], [0], [1], [0, 0, 1, 1], [], []>} : vector<64x32xf32>, vector<32x32xf32>, vector<64x32xf32> -> vector<64x32xf32>
    %20 = vector.broadcast %11 : vector<1x32xf32> to vector<64x32xf32>
    %21 = arith.addf %19, %20 : vector<64x32xf32>
    %22 = vector.shape_cast %21 : vector<64x32xf32> to vector<4x16x32xf32>
    %cst_11 = arith.constant dense<0xFF800000> : vector<4x32xf32>
    %23 = vector.multi_reduction <maximumf>, %22, %cst_11 [1] : vector<4x16x32xf32> to vector<4x32xf32>
    %c0_12 = arith.constant 0 : index
    %c0_13 = arith.constant 0 : index
    %24 = vector.load %arg6[%c0_12, %c0_13] : memref<32x32xf32, #tpu.memory_space<vmem>>, vector<32x32xf32>
    %cst_14 = arith.constant dense<0.000000e+00> : vector<4x32xf32>
    %25 = tpu.matmul %23, %24, %cst_14 {dimension_numbers = #tpu.dot_dimension_numbers<[1], [0], [0], [1], [0, 0, 1, 1], [], []>} : vector<4x32xf32>, vector<32x32xf32>, vector<4x32xf32> -> vector<4x32xf32>
    %c0_15 = arith.constant 0 : index
    %c0_16 = arith.constant 0 : index
    %26 = vector.load %arg7[%c0_15, %c0_16] : memref<1x32xf32, #tpu.memory_space<vmem>>, vector<1x32xf32>
    %27 = vector.broadcast %26 : vector<1x32xf32> to vector<4x32xf32>
    %28 = arith.addf %25, %27 : vector<4x32xf32>
    %cst_17 = arith.constant 0.000000e+00 : f32
    %29 = vector.broadcast %cst_17 : f32 to vector<4x32xf32>
    %30 = arith.maximumf %28, %29 : vector<4x32xf32>
    %c0_18 = arith.constant 0 : index
    %c0_19 = arith.constant 0 : index
    %31 = vector.load %arg8[%c0_18, %c0_19] : memref<32x16xf32, #tpu.memory_space<vmem>>, vector<32x16xf32>
    %cst_20 = arith.constant dense<0.000000e+00> : vector<4x16xf32>
    %32 = tpu.matmul %30, %31, %cst_20 {dimension_numbers = #tpu.dot_dimension_numbers<[1], [0], [0], [1], [0, 0, 1, 1], [], []>} : vector<4x32xf32>, vector<32x16xf32>, vector<4x16xf32> -> vector<4x16xf32>
    %c0_21 = arith.constant 0 : index
    %c0_22 = arith.constant 0 : index
    %33 = vector.load %arg9[%c0_21, %c0_22] : memref<1x16xf32, #tpu.memory_space<vmem>>, vector<1x16xf32>
    %34 = vector.broadcast %33 : vector<1x16xf32> to vector<4x16xf32>
    %35 = arith.addf %32, %34 : vector<4x16xf32>
    %36 = vector.shape_cast %35 : vector<4x16xf32> to vector<2x2x16xf32>
    %cst_23 = arith.constant dense<0xFF800000> : vector<2x16xf32>
    %37 = vector.multi_reduction <maximumf>, %36, %cst_23 [1] : vector<2x2x16xf32> to vector<2x16xf32>
    %c0_24 = arith.constant 0 : index
    %c0_25 = arith.constant 0 : index
    %38 = vector.load %arg10[%c0_24, %c0_25] : memref<2x16xf32, #tpu.memory_space<vmem>>, vector<2x16xf32>
    tpu.vector_store %arg10[%c0_24, %c0_25], %37 {strides = array<i32>} : memref<2x16xf32, #tpu.memory_space<vmem>>, vector<2x16xf32>,
    return
  }
  func.func @transform_0(%arg0: i32) -> (i32, i32) {
    %c0_i32 = arith.constant 0 : i32
    %c0_i32_0 = arith.constant 0 : i32
    return %arg0, %c0_i32 : i32, i32
  }
  func.func @transform_1(%arg0: i32) -> (i32, i32) {
    %c0_i32 = arith.constant 0 : i32
    %c0_i32_0 = arith.constant 0 : i32
    %c0_i32_1 = arith.constant 0 : i32
    return %c0_i32, %c0_i32_0 : i32, i32
  }
  func.func @transform_2(%arg0: i32) -> (i32, i32) {
    %c0_i32 = arith.constant 0 : i32
    %c0_i32_0 = arith.constant 0 : i32
    %c0_i32_1 = arith.constant 0 : i32
    return %c0_i32, %c0_i32_0 : i32, i32
  }
  func.func @transform_3(%arg0: i32) -> (i32, i32) {
    %c0_i32 = arith.constant 0 : i32
    %c0_i32_0 = arith.constant 0 : i32
    %c0_i32_1 = arith.constant 0 : i32
    return %c0_i32, %c0_i32_0 : i32, i32
  }
  func.func @transform_4(%arg0: i32) -> (i32, i32) {
    %c0_i32 = arith.constant 0 : i32
    %c0_i32_0 = arith.constant 0 : i32
    %c0_i32_1 = arith.constant 0 : i32
    return %c0_i32, %c0_i32_0 : i32, i32
  }
  func.func @transform_5(%arg0: i32) -> (i32, i32) {
    %c0_i32 = arith.constant 0 : i32
    %c0_i32_0 = arith.constant 0 : i32
    %c0_i32_1 = arith.constant 0 : i32
    return %c0_i32, %c0_i32_0 : i32, i32
  }
  func.func @transform_6(%arg0: i32) -> (i32, i32) {
    %c0_i32 = arith.constant 0 : i32
    %c0_i32_0 = arith.constant 0 : i32
    %c0_i32_1 = arith.constant 0 : i32
    return %c0_i32, %c0_i32_0 : i32, i32
  }
  func.func @transform_7(%arg0: i32) -> (i32, i32) {
    %c0_i32 = arith.constant 0 : i32
    %c0_i32_0 = arith.constant 0 : i32
    %c0_i32_1 = arith.constant 0 : i32
    return %c0_i32, %c0_i32_0 : i32, i32
  }
  func.func @transform_8(%arg0: i32) -> (i32, i32) {
    %c0_i32 = arith.constant 0 : i32
    %c0_i32_0 = arith.constant 0 : i32
    %c0_i32_1 = arith.constant 0 : i32
    return %c0_i32, %c0_i32_0 : i32, i32
  }
  func.func @transform_9(%arg0: i32) -> (i32, i32) {
    %c0_i32 = arith.constant 0 : i32
    %c0_i32_0 = arith.constant 0 : i32
    return %arg0, %c0_i32 : i32, i32
  }
}

</mosaic_0001>

<bundles_post_ra>
// kernel: tpu_custom_call.1
= control target key start
LH: loop header
LB: loop body
LE: loop exit
PB: predicated region body
PF: predicated region fallthrough
CT: control target
= control target key end

     0   :  { %14 = vsyncpa [#allocation3], 0  ;;  %s1274_s0 = inlined_call_operand.vmem [shape: f32[16,4], index: 0, kind: input, shape index: {}]   ;;  %s1275_s1 = inlined_call_operand.hbm [shape: f32[4,64], index: 1, kind: input, shape index: {}]   ;;  %s1276_s2 = inlined_call_operand.hbm [shape: f32[1,32], index: 2, kind: input, shape index: {}]   ;;  %s1277_s3 = inlined_call_operand.vmem [shape: f32[32,32], index: 3, kind: input, shape index: {}]   ;;  %s1278_s4 = inlined_call_operand.hbm [shape: f32[1,32], index: 4, kind: input, shape index: {}]   ;;  %s1279_s5 = inlined_call_operand.vmem [shape: f32[32,32], index: 5, kind: input, shape index: {}]   ;;  %s1280_s6 = inlined_call_operand.hbm [shape: f32[1,32], index: 6, kind: input, shape index: {}]   ;;  %s1281_s7 = inlined_call_operand.vmem [shape: f32[32,16], index: 7, kind: input, shape index: {}]   ;;  %s1282_s8 = inlined_call_operand.vmem [shape: f32[1,16], index: 8, kind: input, shape index: {}]   ;;  %s1283_s9 = inlined_call_operand.hbm [shape: f32[2,16], index: 9, kind: output, shape index: {}]  }
   0x1   :  { %15 = vsyncpa [#allocation6], 0 }
   0x2   :  { %16 = vsyncpa [#allocation9], 0 }
   0x3   :  { %17 = vsyncpa [#allocation4], 0  ;;  %s1054_s30 = smov [#allocation5]   ;;  %s1055_s11 = smov [#allocation2]  }
   0x4   :  { %s36_s10 = sshll.u32 %s1054_s30, 4  ;;  %s26_s12 = sshll.u32 %s1055_s11, 4  ;;  %s37_s10 = int_to_ptr.vmem [resolvable:$true] %s36_s10  ;;  %s27_s12 = int_to_ptr.vmem [resolvable:$true] %s26_s12 }
   0x5   :  { %s954_s13 = scalar_lea.vmem %s37_s10, 16  ;;  %s958_s14 = scalar_lea.vmem %s37_s10, 32 }
   0x6   :  { %p955_p0 = scmp.ne.s32.totalorder %s37_s10, %s954_s13  ;;  %p959_p1 = scmp.lt.s32.totalorder %s37_s10, %s37_s10 }
   0x7   :  { %p960_p2 = scmp.lt.s32.totalorder %s958_s14, %s954_s13 }
   0x9   :  { %p961_p3 = por %p960_p2, %p959_p1 }
   0xb   :  { %p962_p4 = pnand %p961_p3, %p955_p0 }
   0xd   :  { %965 = shalt.err (!%p962_p4)
}
   0xe   :  { %39 = dma.hbm_to_vmem [thread:$0]  %s1276_s2, 16, %s37_s10, [#allocation6]  }
   0xf   :  { %s974_s17 = scalar_lea.vmem %s27_s12, 64  ;;  %p979_p6 = scmp.lt.s32.totalorder %s27_s12, %s27_s12 }
  0x10   :  { %p975_p5 = scmp.ne.s32.totalorder %s27_s12, %s974_s17  ;;  %p980_p7 = scmp.lt.s32.totalorder %s974_s17, %s974_s17 }
  0x12   :  { %p981_p8 = por %p980_p7, %p979_p6 }
  0x14   :  { %p982_p9 = pnand %p981_p8, %p975_p5 }
  0x16   :  { %985 = shalt.err (!%p982_p9)
}
  0x17   :  { %29 = dma.hbm_to_vmem [thread:$0]  %s1275_s1, 64, %s27_s12, [#allocation3]  }
  0x18   :  { %s1056_s20 = smov [#allocation7]   ;;  %s1057_s22 = smov [#allocation8]  }
  0x19   :  { %s48_s21 = sshll.u32 %s1056_s20, 4  ;;  %s60_s23 = sshll.u32 %s1057_s22, 4  ;;  %s49_s21 = int_to_ptr.vmem [resolvable:$true] %s48_s21  ;;  %s61_s23 = int_to_ptr.vmem [resolvable:$true] %s60_s23 }
  0x1a   :  { %s994_s24 = scalar_lea.vmem %s49_s21, 16  ;;  %s998_s2 = scalar_lea.vmem %s49_s21, 32 }
  0x1b   :  { %p995_p10 = scmp.ne.s32.totalorder %s49_s21, %s994_s24  ;;  %p999_p11 = scmp.lt.s32.totalorder %s49_s21, %s49_s21 }
  0x1c   :  { %p1000_p12 = scmp.lt.s32.totalorder %s998_s2, %s994_s24 }
  0x1e   :  { %p1001_p13 = por %p1000_p12, %p999_p11 }
  0x20   :  { %p1002_p0 = pnand %p1001_p13, %p995_p10 }
  0x22   :  { %1005 = shalt.err (!%p1002_p0)
}
  0x23   :  { %51 = dma.hbm_to_vmem [thread:$0]  %s1278_s4, 16, %s49_s21, [#allocation6]  }
  0x24   :  { %s1014_s27 = scalar_lea.vmem %s61_s23, 16  ;;  %s1018_s1 = scalar_lea.vmem %s61_s23, 32 }
  0x25   :  { %p1015_p1 = scmp.ne.s32.totalorder %s61_s23, %s1014_s27  ;;  %p1019_p2 = scmp.lt.s32.totalorder %s61_s23, %s61_s23 }
  0x26   :  { %p1020_p3 = scmp.lt.s32.totalorder %s1018_s1, %s1014_s27 }
  0x28   :  { %p1021_p4 = por %p1020_p3, %p1019_p2 }
  0x2a   :  { %p1022_p5 = pnand %p1021_p4, %p1015_p1 }
  0x2c   :  { %1025 = shalt.err (!%p1022_p5)
}
  0x2d   :  { %63 = dma.hbm_to_vmem [thread:$0]  %s1280_s6, 16, %s61_s23, [#allocation9]  }
  0x2e   :  { %1046 = dma.done.wait [#allocation3], 64  }
  0x2f   :  { %1047 = vsyncadd [#allocation3], 4294967232 }
  0x30   :  { %1048 = dma.done.wait [#allocation6], 32  }
  0x31   :  { %1049 = vsyncadd [#allocation6], 4294967264 }
  0x32   :  { %1050 = dma.done.wait [#allocation9], 16  }
  0x33   :  { %1051 = vsyncadd [#allocation9], 4294967280  ;;  %vm90_vm0 = vcmask 1043456   ;;  %vm83_vm1 = vcmask 31744   ;;  %v82_v0 = vld [vmem:[#allocation2] sm:$0xf]  ;;  %v195_v5 = vlaneseq }
  0x34   :  { %v80_v1 = vld [vmem:[%s1274_s0] sm:$0xff]  ;;  %v81_v2 = vld [vmem:[%s1274_s0 + $0x8] sm:$0xff]  ;;  %889 = vmatprep.subr.msk.mxu0 %vm90_vm0, %v82_v0  ;;  %v1058_v3 = vmov 1966171168   ;;  %s1059_s0 = smov 96   ;;  %v187_v23 = vld [vmem:[%s1277_s3 + $0x18] sm:$0xff] }
  0x35   :  { %891 = vmatprep.mubr.msk.f32.mxu0 %vm83_vm1, %v80_v1  ;;  %890 = vmatpush3.msk.msra.mxu0 %vm90_vm0, %v82_v0  ;;  %v193_v4 = vunpack.c.l.s4 %v1058_v3  ;;  %v1132_v7 = vshrl.u32 %v195_v5, 7  ;;  %v186_v30 = vld [vmem:[%s1277_s3 + $0x10] sm:$0xff]  ;;  %v185_v31 = vld [vmem:[%s1277_s3 + $0x8] sm:$0xff]  ;;  %v184_v37 = vld [vmem:[%s1277_s3] sm:$0xff]  ;;  %vm463_vm2 = vcmask 261120   ;;  %vm1061_vm3 = vmmov 0  }
  0x36   :  { %892 = vmatmul.mubr.msk.f32.vlgmr.msra.gmra.mxu0 %vm83_vm1, %v81_v2  ;;  %894 = vmatprep.subr.mxu1 %v187_v23  ;;  %v850_v62 = vld [vmem:[#allocation5] ss:$0 sm:$0xff]  ;;  %vm636_vm4 = vcmask 1041409   ;;  %vm638_vm5 = vcmask 1042434   ;;  %vm640_vm6 = vcmask 1043459   ;;  %vm810_vm7 = vcmask 123904  }
  0x37   :  { %v194_v6 = vunpack.c.0.s8 %v193_v4  ;;  %v1142_v11 = vsub.s32 0, %v1132_v7  ;;  %895 = vmatpush3.msra.mxu1 %v187_v23 }
  0x38   :  { %896 = vmatprep.subr.mxu1 %v186_v30 }
  0x39   :  { %v1135_v8 = vsub.s32 %v194_v6, %v1132_v7  ;;  %897 = vmatpush3.msra.mxu1 %v186_v30 }
  0x3a   :  { %898 = vmatprep.subr.mxu1 %v185_v31 }
  0x3b   :  { %899 = vmatpush3.msra.mxu1 %v185_v31 }
  0x3c   :  { %900 = vmatprep.subr.mxu1 %v184_v37 }
  0x3d   :  { %901 = vmatpush3.msra.mxu1 %v184_v37 }
  0xf6   :  { %v1137_v9 = vpop.f32.mrf.mxu0 }
  0xf7   :  { %v247_v10 = vrot.slane %v1137_v9, %v1135_v8  ;;  %v240_v33 = vcombine.high %v1137_v9, %v1137_v9 }
  0xf8   :  { %v1144_v12 = vpop.f32.mrf.mxu0 }
  0xf9   :  { %v198_v13 = vrot.slane %v1144_v12, %v1135_v8  ;;  %v263_v14 = vrot.slane %v247_v10, %v1135_v8  ;;  %v255_v15 = vcombine.high %v247_v10, %v247_v10  ;;  %v191_v19 = vcombine.high %v1144_v12, %v1144_v12 }
  0xfa   :  { %v254_v40 = vrot.slane %v240_v33, %v1135_v8  ;;  %v176_v0 = vadd.f32 %v850_v62, %v1144_v12 }
  0xfb   :  { %v214_v16 = vrot.slane %v198_v13, %v1135_v8  ;;  %v324_v17 = vrot.slane %v263_v14, %v1142_v11  ;;  %v277_v18 = vrot.slane %v255_v15, %v1135_v8  ;;  %v206_v20 = vcombine.high %v198_v13, %v198_v13 }
  0xfc   :  { %v285_v24 = vcombine.high %v263_v14, %v263_v14  ;;  %v205_v26 = vrot.slane %v191_v19, %v1135_v8  ;;  %v256_v45 = vcombine.high %v254_v40, %v254_v40  ;;  %v270_v49 = vrot.slane %v254_v40, %v1135_v8 }
  0xfd   :  { %369 = vrot.lane.b32.xlu0 %v324_v17, %s1059_s0  ;;  %v328_v21 = vrot.slane %v277_v18, %v1142_v11  ;;  %v236_v22 = vcombine.high %v214_v16, %v214_v16  ;;  %v292_v25 = vrot.slane %v214_v16, %v1142_v11  ;;  %v287_v27 = vcombine.high %v277_v18, %v277_v18 }
  0xfe   :  { %v228_v29 = vrot.slane %v206_v20, %v1135_v8  ;;  %v332_v32 = vrot.slane %v285_v24, %v1142_v11  ;;  %v207_v34 = vcombine.high %v205_v26, %v205_v26  ;;  %v221_v39 = vrot.slane %v205_v26, %v1135_v8 }
  0xff   :  { %371 = vrot.lane.b32.xlu1 %v328_v21, %s1059_s0  ;;  %v300_v28 = vrot.slane %v236_v22, %v1142_v11  ;;  %v336_v35 = vrot.slane %v287_v27, %v1142_v11  ;;  %v284_v51 = vrot.slane %v256_v45, %v1135_v8  ;;  %v340_v52 = vrot.slane %v270_v49, %v1142_v11 }
 0x100   :  { %v238_v36 = vcombine.high %v228_v29, %v228_v29  ;;  %v296_v38 = vrot.slane %v228_v29, %v1142_v11  ;;  %v235_v42 = vrot.slane %v207_v34, %v1135_v8  ;;  %v308_v43 = vrot.slane %v221_v39, %v1142_v11 }
 0x101   :  { %353 = vrot.lane.b32.xlu0 %v292_v25, %s1059_s0  ;;  %v237_v44 = vcombine.high %v221_v39, %v221_v39  ;;  %v286_v53 = vcombine.high %v270_v49, %v270_v49  ;;  %v344_v54 = vrot.slane %v284_v51, %v1142_v11  ;;  %v288_v55 = vcombine.high %v284_v51, %v284_v51 }
 0x102   :  { %v304_v41 = vrot.slane %v238_v36, %v1142_v11  ;;  %v312_v46 = vrot.slane %v235_v42, %v1142_v11  ;;  %v239_v47 = vcombine.high %v235_v42, %v235_v42  ;;  %v177_v19 = vadd.f32 %v1137_v9, %v850_v62  ;;  %v851_v62 = vld [vmem:[#allocation7] ss:$0 sm:$0xff] }
 0x103   :  { %357 = vrot.lane.b32.xlu1 %v300_v28, %s1059_s0  ;;  %v316_v48 = vrot.slane %v237_v44, %v1142_v11  ;;  %v348_v56 = vrot.slane %v286_v53, %v1142_v11  ;;  %v352_v57 = vrot.slane %v288_v55, %v1142_v11 }
 0x104   :  { %v320_v50 = vrot.slane %v239_v47, %v1142_v11  ;;  %v180_v11 = vcombine.high %v176_v0, %v176_v0 }
 0x105   :  { %373 = vrot.lane.b32.xlu0 %v332_v32, %s1059_s0  ;;  %v181_v32 = vcombine.high %v177_v19, %v177_v19 }
 0x107   :  { %375 = vrot.lane.b32.xlu1 %v336_v35, %s1059_s0 }
 0x109   :  { %355 = vrot.lane.b32.xlu0 %v296_v38, %s1059_s0 }
 0x10b   :  { %359 = vrot.lane.b32.xlu1 %v304_v41, %s1059_s0 }
 0x10d   :  { %361 = vrot.lane.b32.xlu0 %v308_v43, %s1059_s0 }
 0x10f   :  { %363 = vrot.lane.b32.xlu1 %v312_v46, %s1059_s0 }
 0x111   :  { %365 = vrot.lane.b32.xlu0 %v316_v48, %s1059_s0 }
 0x113   :  { %367 = vrot.lane.b32.xlu1 %v320_v50, %s1059_s0 }
 0x115   :  { %377 = vrot.lane.b32.xlu0 %v340_v52, %s1059_s0 }
 0x117   :  { %379 = vrot.lane.b32.xlu1 %v344_v54, %s1059_s0 }
 0x119   :  { %381 = vrot.lane.b32.xlu0 %v348_v56, %s1059_s0  ;;  %v624_v56 = vld [vmem:[%s1279_s5 + $0x18] sm:$0xff] }
 0x11b   :  { %383 = vrot.lane.b32.xlu1 %v352_v57, %s1059_s0  ;;  %v1060_v57 = vmov 0.0  }
 0x11c   :  { %914 = vmatprep.subr.mxu0 %v1060_v57  ;;  %922 = vmatprep.mubr.msk.f32.mxu0 %vm1061_vm3, %v1060_v57 }
 0x11d   :  { %915 = vmatpush3.msra.mxu0 %v624_v56  ;;  %v716_v56 = vld [vmem:[%s1281_s7 + $0x8] sm:$0xff] }
 0x11e   :  { %916 = vmatprep.subr.mxu0 %v1060_v57 }
 0x16f   :  { %v370_v58 = vpop.permute.xlu0 %369 }
 0x170   :  { %v409_v27 = vadd.f32 %v370_v58, %v177_v19  ;;  %v623_v58 = vld [vmem:[%s1279_s5 + $0x10] sm:$0xff] }
 0x171   :  { %v372_v59 = vpop.permute.xlu1 %371  ;;  %917 = vmatpush3.msra.mxu0 %v623_v58  ;;  %v715_v58 = vld [vmem:[%s1281_s7] sm:$0xff] }
 0x172   :  { %v410_v22 = vadd.f32 %v372_v59, %v177_v19  ;;  %v425_v38 = vmax.f32 %v409_v27, 0.0  ;;  %v622_v59 = vld [vmem:[%s1279_s5 + $0x8] sm:$0xff]  ;;  %918 = vmatprep.subr.mxu0 %v1060_v57 }
 0x173   :  { %v354_v60 = vpop.permute.xlu0 %353  ;;  %919 = vmatpush3.msra.mxu0 %v622_v59  ;;  %v860_v59 = vld [vmem:[#allocation8] ss:$0 sm:$0xff] }
 0x174   :  { %v401_v2 = vadd.f32 %v354_v60, %v176_v0  ;;  %v426_v33 = vmax.f32 %v410_v22, 0.0  ;;  %v621_v60 = vld [vmem:[%s1279_s5] sm:$0xff]  ;;  %920 = vmatprep.subr.mxu0 %v1060_v57 }
 0x175   :  { %v358_v61 = vpop.permute.xlu1 %357  ;;  %921 = vmatpush3.msra.mxu0 %v621_v60 }
 0x176   :  { %v403_v4 = vadd.f32 %v358_v61, %v176_v0  ;;  %v417_v8 = vmax.f32 %v401_v2, 0.0  ;;  %v459_v43 = vcombine.low %v425_v38, %v426_v33  ;;  %925 = vmatprep.subr.mxu0 %v1060_v57 }
 0x177   :  { %v374_v63 = vpop.permute.xlu0 %373 }
 0x178   :  { %v419_v15 = vmax.f32 %v403_v4, 0.0  ;;  %v411_v34 = vadd.f32 %v374_v63, %v177_v19 }
 0x179   :  { %v376_v1 = vpop.permute.xlu1 %375 }
 0x17a   :  { %v412_v29 = vadd.f32 %v376_v1, %v177_v19  ;;  %v427_v45 = vmax.f32 %v411_v34, 0.0 }
 0x17b   :  { %v356_v3 = vpop.permute.xlu0 %355 }
 0x17c   :  { %v402_v5 = vadd.f32 %v356_v3, %v176_v0  ;;  %v428_v40 = vmax.f32 %v412_v29, 0.0 }
 0x17d   :  { %v360_v6 = vpop.permute.xlu1 %359 }
 0x17e   :  { %v418_v10 = vmax.f32 %v402_v5, 0.0  ;;  %v404_v13 = vadd.f32 %v360_v6, %v176_v0  ;;  %v460_v50 = vcombine.low %v427_v45, %v428_v40 }
 0x17f   :  { %v362_v14 = vpop.permute.xlu0 %361 }
 0x180   :  { %v420_v16 = vmax.f32 %v404_v13, 0.0  ;;  %v405_v17 = vadd.f32 %v362_v14, %v180_v11  ;;  %v455_v18 = vcombine.low %v417_v8, %v418_v10 }
 0x181   :  { %v364_v20 = vpop.permute.xlu1 %363 }
 0x182   :  { %v456_v12 = vcombine.low %v419_v15, %v420_v16  ;;  %v406_v21 = vadd.f32 %v364_v20, %v180_v11  ;;  %902 = vmatprep.mubr.msk.f32.mxu1 %vm463_vm2, %v455_v18  ;;  %v421_v24 = vmax.f32 %v405_v17, 0.0 }
 0x183   :  { %v366_v23 = vpop.permute.xlu0 %365 }
 0x184   :  { %v422_v25 = vmax.f32 %v406_v21, 0.0  ;;  %v407_v26 = vadd.f32 %v366_v23, %v180_v11  ;;  %903 = vmatmul.mubr.msk.f32.vlgmr.msra.gmra.mxu1 %vm463_vm2, %v456_v12 }
 0x185   :  { %v368_v28 = vpop.permute.xlu1 %367 }
 0x186   :  { %v457_v30 = vcombine.low %v421_v24, %v422_v25  ;;  %v408_v31 = vadd.f32 %v368_v28, %v180_v11  ;;  %v423_v35 = vmax.f32 %v407_v26, 0.0 }
 0x187   :  { %v378_v9 = vpop.permute.xlu0 %377 }
 0x188   :  { %v424_v36 = vmax.f32 %v408_v31, 0.0  ;;  %v413_v37 = vadd.f32 %v378_v9, %v181_v32  ;;  %905 = vmatprep.mubr.msk.f32.mxu1 %vm463_vm2, %v457_v30 }
 0x189   :  { %v380_v39 = vpop.permute.xlu1 %379 }
 0x18a   :  { %v458_v41 = vcombine.low %v423_v35, %v424_v36  ;;  %v414_v42 = vadd.f32 %v380_v39, %v181_v32  ;;  %v429_v46 = vmax.f32 %v413_v37, 0.0 }
 0x18b   :  { %v382_v44 = vpop.permute.xlu0 %381 }
 0x18c   :  { %v430_v47 = vmax.f32 %v414_v42, 0.0  ;;  %v415_v48 = vadd.f32 %v382_v44, %v181_v32  ;;  %906 = vmatmul.mubr.msk.f32.gmra.mxu1 %vm463_vm2, %v458_v41 }
 0x18d   :  { %v384_v49 = vpop.permute.xlu1 %383  ;;  %908 = vmatprep.mubr.msk.f32.mxu1 %vm463_vm2, %v459_v43 }
 0x18e   :  { %v461_v51 = vcombine.low %v429_v46, %v430_v47  ;;  %v416_v52 = vadd.f32 %v384_v49, %v181_v32  ;;  %v431_v53 = vmax.f32 %v415_v48, 0.0 }
 0x190   :  { %v432_v54 = vmax.f32 %v416_v52, 0.0  ;;  %909 = vmatmul.mubr.msk.f32.gmra.mxu1 %vm463_vm2, %v460_v50 }
 0x191   :  { %911 = vmatprep.mubr.msk.f32.mxu1 %vm463_vm2, %v461_v51 }
 0x192   :  { %v462_v55 = vcombine.low %v431_v53, %v432_v54  ;;  %v718_v53 = vld [vmem:[%s1281_s7 + $0x18] sm:$0xff] }
 0x194   :  { %912 = vmatmul.mubr.msk.f32.gmra.mxu1 %vm463_vm2, %v462_v55  ;;  %v717_v55 = vld [vmem:[%s1281_s7 + $0x10] sm:$0xff]  ;;  %s1063_s7 = smov [#allocation10]  }
 0x244   :  { %v904_v61 = vpop.f32.mrf.mxu1 }
 0x245   :  { %v552_v0 = vadd.f32 %v904_v61, %v851_v62 }
 0x246   :  { %v546_v63 = vpop.f32.mrf.mxu1 }
 0x247   :  { %v547_v1 = vadd.f32 %v851_v62, %v546_v63  ;;  %v586_v3 = vsel %vm463_vm2, %v552_v0, -inf  ;;  %v1062_v0 = vmov 1983009808  }
 0x249   :  { %v585_v2 = vsel %vm463_vm2, %v547_v1, -inf  ;;  %v801_v1 = vunpack.c.l.s4 %v1062_v0 }
 0x24a   :  { %v587_v4 = vmax.f32 %v585_v2, %v586_v3  ;;  %v862_v3 = vld [vmem:[%s1282_s8] ss:$0 sm:$0xff]  ;;  %s836_s8 = sshll.u32 %s1063_s7, 4  ;;  %s837_s8 = int_to_ptr.vmem [resolvable:$true] %s836_s8 }
 0x24b   :  { %v802_v2 = vunpack.c.0.s8 %v801_v1  ;;  %s1026_s11 = scalar_lea.vmem %s837_s8, 32  ;;  %p1031_p7 = scmp.lt.s32.totalorder %s837_s8, %s837_s8 }
 0x24c   :  { %v907_v5 = vpop.f32.mrf.mxu1  ;;  %v588_v13 = vrot.slane %v587_v4, 4  ;;  %p1027_p6 = scmp.ne.s32.totalorder %s837_s8, %s1026_s11  ;;  %p1032_p8 = scmp.lt.s32.totalorder %s1026_s11, %s1026_s11 }
 0x24d   :  { %v562_v6 = vadd.f32 %v907_v5, %v851_v62 }
 0x24e   :  { %v556_v8 = vpop.f32.mrf.mxu1  ;;  %v589_v20 = vmax.f32 %v587_v4, %v588_v13  ;;  %v805_v4 = vsub.s32 %v802_v2, %v1132_v7  ;;  %p1033_p9 = por %p1032_p8, %p1031_p7 }
 0x24f   :  { %v557_v10 = vadd.f32 %v851_v62, %v556_v8  ;;  %v595_v14 = vsel %vm463_vm2, %v562_v6, -inf }
 0x250   :  { %v910_v11 = vpop.f32.mrf.mxu1  ;;  %v590_v29 = vrot.slane %v589_v20, 2  ;;  %p1034_p10 = pnand %p1033_p9, %p1027_p6 }
 0x251   :  { %v594_v15 = vsel %vm463_vm2, %v557_v10, -inf  ;;  %v572_v16 = vadd.f32 %v910_v11, %v851_v62 }
 0x252   :  { %v596_v17 = vmax.f32 %v594_v15, %v595_v14  ;;  %v566_v18 = vpop.f32.mrf.mxu1  ;;  %v591_v36 = vmax.f32 %v589_v20, %v590_v29 }
 0x253   :  { %v567_v19 = vadd.f32 %v851_v62, %v566_v18  ;;  %v604_v22 = vsel %vm463_vm2, %v572_v16, -inf }
 0x254   :  { %v597_v12 = vrot.slane %v596_v17, 4  ;;  %v913_v21 = vpop.f32.mrf.mxu1  ;;  %v592_v42 = vrot.slane %v591_v36, 1 }
 0x255   :  { %v603_v23 = vsel %vm463_vm2, %v567_v19, -inf  ;;  %v582_v24 = vadd.f32 %v913_v21, %v851_v62 }
 0x256   :  { %v598_v25 = vmax.f32 %v596_v17, %v597_v12  ;;  %v605_v26 = vmax.f32 %v603_v23, %v604_v22  ;;  %v576_v27 = vpop.f32.mrf.mxu1  ;;  %v593_v48 = vmax.f32 %v591_v36, %v592_v42 }
 0x257   :  { %v577_v28 = vadd.f32 %v851_v62, %v576_v27  ;;  %v613_v32 = vsel %vm463_vm2, %v582_v24, -inf }
 0x258   :  { %v599_v30 = vrot.slane %v598_v25, 2  ;;  %v606_v31 = vrot.slane %v605_v26, 4 }
 0x259   :  { %v612_v33 = vsel %vm463_vm2, %v577_v28, -inf }
 0x25a   :  { %v600_v9 = vmax.f32 %v598_v25, %v599_v30  ;;  %v607_v34 = vmax.f32 %v605_v26, %v606_v31  ;;  %v614_v35 = vmax.f32 %v612_v33, %v613_v32 }
 0x25c   :  { %v608_v37 = vrot.slane %v607_v34, 2  ;;  %v615_v38 = vrot.slane %v614_v35, 4  ;;  %v601_v39 = vrot.slane %v600_v9, 1 }
 0x25e   :  { %v609_v40 = vmax.f32 %v607_v34, %v608_v37  ;;  %v616_v41 = vmax.f32 %v614_v35, %v615_v38  ;;  %v602_v45 = vmax.f32 %v600_v9, %v601_v39 }
 0x260   :  { %v610_v43 = vrot.slane %v609_v40, 1  ;;  %v617_v44 = vrot.slane %v616_v41, 2  ;;  %v637_v51 = vsel %vm636_vm4, %v602_v45, %v593_v48 }
 0x262   :  { %v618_v46 = vmax.f32 %v616_v41, %v617_v44  ;;  %v611_v47 = vmax.f32 %v609_v40, %v610_v43 }
 0x264   :  { %v619_v49 = vrot.slane %v618_v46, 1  ;;  %v639_v52 = vsel %vm638_vm5, %v611_v47, %v637_v51 }
 0x266   :  { %v620_v50 = vmax.f32 %v618_v46, %v619_v49 }
 0x268   :  { %v641_v54 = vsel %vm640_vm6, %v620_v50, %v639_v52 }
 0x269   :  { %923 = vmatmul.mubr.msk.f32.vlgmr.msra.gmra.mxu0 %vm463_vm2, %v641_v54 }
 0x26a   :  { %926 = vmatpush3.msra.mxu0 %v718_v53  ;;  %933 = vmatprep.mubr.msk.f32.mxu0 %vm1061_vm3, %v1060_v57 }
 0x26b   :  { %927 = vmatprep.subr.mxu0 %v1060_v57 }
 0x26c   :  { %928 = vmatpush3.msra.mxu0 %v717_v55 }
 0x26d   :  { %929 = vmatprep.subr.mxu0 %v1060_v57 }
 0x26e   :  { %930 = vmatpush3.msra.mxu0 %v716_v56 }
 0x26f   :  { %931 = vmatprep.subr.mxu0 %v1060_v57 }
 0x270   :  { %932 = vmatpush3.msra.mxu0 %v715_v58 }
 0x329   :  { %v710_v60 = vpop.f32.mrf.mxu0 }
 0x32a   :  { %v711_v61 = vadd.f32 %v860_v59, %v710_v60 }
 0x32b   :  { %v924_v62 = vpop.f32.mrf.mxu0 }
 0x32c   :  { %v714_v63 = vmax.f32 %v711_v61, 0.0 }
 0x32e   :  { %934 = vmatmul.mubr.msk.f32.vlgmr.msra.gmra.mxu0 %vm463_vm2, %v714_v63 }
 0x3ee   :  { %v795_v5 = vpop.f32.mrf.mxu0 }
 0x3ef   :  { %v796_v6 = vadd.f32 %v862_v3, %v795_v5 }
 0x3f0   :  { %v935_v57 = vpop.f32.mrf.mxu0 }
 0x3f1   :  { %v806_v8 = vrot.slane %v796_v6, %v805_v4 }
 0x3f3   :  { %v807_v10 = vcombine.high %v806_v8, %v806_v8  ;;  %v811_v13 = vsel %vm810_vm7, %v806_v8, -inf }
 0x3f4   :  { %v812_v11 = vrot.slane %v811_v13, 4 }
 0x3f5   :  { %v818_v14 = vsel %vm810_vm7, %v807_v10, -inf }
 0x3f6   :  { %v813_v15 = vmax.f32 %v811_v13, %v812_v11  ;;  %v819_v16 = vrot.slane %v818_v14, 4 }
 0x3f8   :  { %v814_v17 = vrot.slane %v813_v15, 2  ;;  %v820_v18 = vmax.f32 %v818_v14, %v819_v16 }
 0x3fa   :  { %v815_v19 = vmax.f32 %v813_v15, %v814_v17  ;;  %v821_v20 = vrot.slane %v820_v18, 2 }
 0x3fc   :  { %v816_v12 = vrot.slane %v815_v19, 1  ;;  %v822_v21 = vmax.f32 %v820_v18, %v821_v20 }
 0x3fe   :  { %v823_v7 = vrot.slane %v822_v21, 1  ;;  %v817_v22 = vmax.f32 %v815_v19, %v816_v12 }
 0x400   :  { %v824_v23 = vmax.f32 %v822_v21, %v823_v7 }
 0x402   :  { %v827_v24 = vsel %vm636_vm4, %v824_v23, %v817_v22 }
 0x403   :  { %829 = vst.msk [vmem:[#allocation10] sm:$0x3] %vm810_vm7, %v827_v24 }
 0x404   :  { %1037 = shalt.err (!%p1034_p10)
}
 0x405   :  { %839 = dma.vmem_to_hbm [thread:$0]  %s837_s8, 32, %s1283_s9, [#allocation4]  }
 0x406   :  { %1052 = dma.done.wait [#allocation4], 32  }
 0x407   :  { %1053 = vsyncadd [#allocation4], 4294967264 }
 0x408   :  { %843 = vsyncpa [#allocation3], 1 }
 0x409   :  { %844 = vsyncpa [#allocation6], 1 }
 0x40a   :  { %845 = vsyncpa [#allocation9], 1 }
 0x40b   :  { %846 = vsyncpa [#allocation4], 1 }

// kernel: tpu_custom_call.1
= control target key start
LH: loop header
LB: loop body
LE: loop exit
PB: predicated region body
PF: predicated region fallthrough
CT: control target
= control target key end

     0   :  { %14 = vsyncpa [#allocation3], 0  ;;  %s1274_s0 = inlined_call_operand.vmem [shape: f32[16,4], index: 0, kind: input, shape index: {}]   ;;  %s1275_s1 = inlined_call_operand.hbm [shape: f32[4,64], index: 1, kind: input, shape index: {}]   ;;  %s1276_s2 = inlined_call_operand.hbm [shape: f32[1,32], index: 2, kind: input, shape index: {}]   ;;  %s1277_s3 = inlined_call_operand.vmem [shape: f32[32,32], index: 3, kind: input, shape index: {}]   ;;  %s1278_s4 = inlined_call_operand.hbm [shape: f32[1,32], index: 4, kind: input, shape index: {}]   ;;  %s1279_s5 = inlined_call_operand.vmem [shape: f32[32,32], index: 5, kind: input, shape index: {}]   ;;  %s1280_s6 = inlined_call_operand.hbm [shape: f32[1,32], index: 6, kind: input, shape index: {}]   ;;  %s1281_s7 = inlined_call_operand.vmem [shape: f32[32,16], index: 7, kind: input, shape index: {}]   ;;  %s1282_s8 = inlined_call_operand.vmem [shape: f32[1,16], index: 8, kind: input, shape index: {}]   ;;  %s1283_s9 = inlined_call_operand.hbm [shape: f32[2,16], index: 9, kind: output, shape index: {}]  }
   0x1   :  { %15 = vsyncpa [#allocation6], 0 }
   0x2   :  { %16 = vsyncpa [#allocation9], 0 }
   0x3   :  { %17 = vsyncpa [#allocation4], 0  ;;  %s1054_s30 = smov [#allocation5]   ;;  %s1055_s11 = smov [#allocation2]  }
   0x4   :  { %s36_s10 = sshll.u32 %s1054_s30, 4  ;;  %s26_s12 = sshll.u32 %s1055_s11, 4  ;;  %s37_s10 = int_to_ptr.vmem [resolvable:$true] %s36_s10  ;;  %s27_s12 = int_to_ptr.vmem [resolvable:$true] %s26_s12 }
   0x5   :  { %s954_s13 = scalar_lea.vmem %s37_s10, 16  ;;  %s958_s14 = scalar_lea.vmem %s37_s10, 32 }
   0x6   :  { %p955_p0 = scmp.ne.s32.totalorder %s37_s10, %s954_s13  ;;  %p959_p1 = scmp.lt.s32.totalorder %s37_s10, %s37_s10 }
   0x7   :  { %p960_p2 = scmp.lt.s32.totalorder %s958_s14, %s954_s13 }
   0x9   :  { %p961_p3 = por %p960_p2, %p959_p1 }
   0xb   :  { %p962_p4 = pnand %p961_p3, %p955_p0 }
   0xd   :  { %965 = shalt.err (!%p962_p4)
}
   0xe   :  { %39 = dma.hbm_to_vmem [thread:$0]  %s1276_s2, 16, %s37_s10, [#allocation6]  }
   0xf   :  { %s974_s17 = scalar_lea.vmem %s27_s12, 64  ;;  %p979_p6 = scmp.lt.s32.totalorder %s27_s12, %s27_s12 }
  0x10   :  { %p975_p5 = scmp.ne.s32.totalorder %s27_s12, %s974_s17  ;;  %p980_p7 = scmp.lt.s32.totalorder %s974_s17, %s974_s17 }
  0x12   :  { %p981_p8 = por %p980_p7, %p979_p6 }
  0x14   :  { %p982_p9 = pnand %p981_p8, %p975_p5 }
  0x16   :  { %985 = shalt.err (!%p982_p9)
}
  0x17   :  { %29 = dma.hbm_to_vmem [thread:$0]  %s1275_s1, 64, %s27_s12, [#allocation3]  }
  0x18   :  { %s1056_s20 = smov [#allocation7]   ;;  %s1057_s22 = smov [#allocation8]  }
  0x19   :  { %s48_s21 = sshll.u32 %s1056_s20, 4  ;;  %s60_s23 = sshll.u32 %s1057_s22, 4  ;;  %s49_s21 = int_to_ptr.vmem [resolvable:$true] %s48_s21  ;;  %s61_s23 = int_to_ptr.vmem [resolvable:$true] %s60_s23 }
  0x1a   :  { %s994_s24 = scalar_lea.vmem %s49_s21, 16  ;;  %s998_s2 = scalar_lea.vmem %s49_s21, 32 }
  0x1b   :  { %p995_p10 = scmp.ne.s32.totalorder %s49_s21, %s994_s24  ;;  %p999_p11 = scmp.lt.s32.totalorder %s49_s21, %s49_s21 }
  0x1c   :  { %p1000_p12 = scmp.lt.s32.totalorder %s998_s2, %s994_s24 }
  0x1e   :  { %p1001_p13 = por %p1000_p12, %p999_p11 }
  0x20   :  { %p1002_p0 = pnand %p1001_p13, %p995_p10 }
  0x22   :  { %1005 = shalt.err (!%p1002_p0)
}
  0x23   :  { %51 = dma.hbm_to_vmem [thread:$0]  %s1278_s4, 16, %s49_s21, [#allocation6]  }
  0x24   :  { %s1014_s27 = scalar_lea.vmem %s61_s23, 16  ;;  %s1018_s1 = scalar_lea.vmem %s61_s23, 32 }
  0x25   :  { %p1015_p1 = scmp.ne.s32.totalorder %s61_s23, %s1014_s27  ;;  %p1019_p2 = scmp.lt.s32.totalorder %s61_s23, %s61_s23 }
  0x26   :  { %p1020_p3 = scmp.lt.s32.totalorder %s1018_s1, %s1014_s27 }
  0x28   :  { %p1021_p4 = por %p1020_p3, %p1019_p2 }
  0x2a   :  { %p1022_p5 = pnand %p1021_p4, %p1015_p1 }
  0x2c   :  { %1025 = shalt.err (!%p1022_p5)
}
  0x2d   :  { %63 = dma.hbm_to_vmem [thread:$0]  %s1280_s6, 16, %s61_s23, [#allocation9]  }
  0x2e   :  { %1046 = dma.done.wait [#allocation3], 64  }
  0x2f   :  { %1047 = vsyncadd [#allocation3], 4294967232 }
  0x30   :  { %1048 = dma.done.wait [#allocation6], 32  }
  0x31   :  { %1049 = vsyncadd [#allocation6], 4294967264 }
  0x32   :  { %1050 = dma.done.wait [#allocation9], 16  }
  0x33   :  { %1051 = vsyncadd [#allocation9], 4294967280  ;;  %vm90_vm0 = vcmask 1043456   ;;  %vm83_vm1 = vcmask 31744   ;;  %v82_v0 = vld [vmem:[#allocation2] sm:$0xf]  ;;  %v195_v5 = vlaneseq }
  0x34   :  { %v80_v1 = vld [vmem:[%s1274_s0] sm:$0xff]  ;;  %v81_v2 = vld [vmem:[%s1274_s0 + $0x8] sm:$0xff]  ;;  %889 = vmatprep.subr.msk.mxu0 %vm90_vm0, %v82_v0  ;;  %v1058_v3 = vmov 1966171168   ;;  %s1059_s0 = smov 96   ;;  %v187_v23 = vld [vmem:[%s1277_s3 + $0x18] sm:$0xff] }
  0x35   :  { %891 = vmatprep.mubr.msk.f32.mxu0 %vm83_vm1, %v80_v1  ;;  %890 = vmatpush3.msk.msra.mxu0 %vm90_vm0, %v82_v0  ;;  %v193_v4 = vunpack.c.l.s4 %v1058_v3  ;;  %v1132_v7 = vshrl.u32 %v195_v5, 7  ;;  %v186_v30 = vld [vmem:[%s1277_s3 + $0x10] sm:$0xff]  ;;  %v185_v31 = vld [vmem:[%s1277_s3 + $0x8] sm:$0xff]  ;;  %v184_v37 = vld [vmem:[%s1277_s3] sm:$0xff]  ;;  %vm463_vm2 = vcmask 261120   ;;  %vm1061_vm3 = vmmov 0  }
  0x36   :  { %892 = vmatmul.mubr.msk.f32.vlgmr.msra.gmra.mxu0 %vm83_vm1, %v81_v2  ;;  %894 = vmatprep.subr.mxu1 %v187_v23  ;;  %v850_v62 = vld [vmem:[#allocation5] ss:$0 sm:$0xff]  ;;  %vm636_vm4 = vcmask 1041409   ;;  %vm638_vm5 = vcmask 1042434   ;;  %vm640_vm6 = vcmask 1043459   ;;  %vm810_vm7 = vcmask 123904  }
  0x37   :  { %v194_v6 = vunpack.c.0.s8 %v193_v4  ;;  %v1142_v11 = vsub.s32 0, %v1132_v7  ;;  %895 = vmatpush3.msra.mxu1 %v187_v23 }
  0x38   :  { %896 = vmatprep.subr.mxu1 %v186_v30 }
  0x39   :  { %v1135_v8 = vsub.s32 %v194_v6, %v1132_v7  ;;  %897 = vmatpush3.msra.mxu1 %v186_v30 }
  0x3a   :  { %898 = vmatprep.subr.mxu1 %v185_v31 }
  0x3b   :  { %899 = vmatpush3.msra.mxu1 %v185_v31 }
  0x3c   :  { %900 = vmatprep.subr.mxu1 %v184_v37 }
  0x3d   :  { %901 = vmatpush3.msra.mxu1 %v184_v37 }
  0xf6   :  { %v1137_v9 = vpop.f32.mrf.mxu0 }
  0xf7   :  { %v247_v10 = vrot.slane %v1137_v9, %v1135_v8  ;;  %v240_v33 = vcombine.high %v1137_v9, %v1137_v9 }
  0xf8   :  { %v1144_v12 = vpop.f32.mrf.mxu0 }
  0xf9   :  { %v198_v13 = vrot.slane %v1144_v12, %v1135_v8  ;;  %v263_v14 = vrot.slane %v247_v10, %v1135_v8  ;;  %v255_v15 = vcombine.high %v247_v10, %v247_v10  ;;  %v191_v19 = vcombine.high %v1144_v12, %v1144_v12 }
  0xfa   :  { %v254_v40 = vrot.slane %v240_v33, %v1135_v8  ;;  %v176_v0 = vadd.f32 %v850_v62, %v1144_v12 }
  0xfb   :  { %v214_v16 = vrot.slane %v198_v13, %v1135_v8  ;;  %v324_v17 = vrot.slane %v263_v14, %v1142_v11  ;;  %v277_v18 = vrot.slane %v255_v15, %v1135_v8  ;;  %v206_v20 = vcombine.high %v198_v13, %v198_v13 }
  0xfc   :  { %v285_v24 = vcombine.high %v263_v14, %v263_v14  ;;  %v205_v26 = vrot.slane %v191_v19, %v1135_v8  ;;  %v256_v45 = vcombine.high %v254_v40, %v254_v40  ;;  %v270_v49 = vrot.slane %v254_v40, %v1135_v8 }
  0xfd   :  { %369 = vrot.lane.b32.xlu0 %v324_v17, %s1059_s0  ;;  %v328_v21 = vrot.slane %v277_v18, %v1142_v11  ;;  %v236_v22 = vcombine.high %v214_v16, %v214_v16  ;;  %v292_v25 = vrot.slane %v214_v16, %v1142_v11  ;;  %v287_v27 = vcombine.high %v277_v18, %v277_v18 }
  0xfe   :  { %v228_v29 = vrot.slane %v206_v20, %v1135_v8  ;;  %v332_v32 = vrot.slane %v285_v24, %v1142_v11  ;;  %v207_v34 = vcombine.high %v205_v26, %v205_v26  ;;  %v221_v39 = vrot.slane %v205_v26, %v1135_v8 }
  0xff   :  { %371 = vrot.lane.b32.xlu1 %v328_v21, %s1059_s0  ;;  %v300_v28 = vrot.slane %v236_v22, %v1142_v11  ;;  %v336_v35 = vrot.slane %v287_v27, %v1142_v11  ;;  %v284_v51 = vrot.slane %v256_v45, %v1135_v8  ;;  %v340_v52 = vrot.slane %v270_v49, %v1142_v11 }
 0x100   :  { %v238_v36 = vcombine.high %v228_v29, %v228_v29  ;;  %v296_v38 = vrot.slane %v228_v29, %v1142_v11  ;;  %v235_v42 = vrot.slane %v207_v34, %v1135_v8  ;;  %v308_v43 = vrot.slane %v221_v39, %v1142_v11 }
 0x101   :  { %353 = vrot.lane.b32.xlu0 %v292_v25, %s1059_s0  ;;  %v237_v44 = vcombine.high %v221_v39, %v221_v39  ;;  %v286_v53 = vcombine.high %v270_v49, %v270_v49  ;;  %v344_v54 = vrot.slane %v284_v51, %v1142_v11  ;;  %v288_v55 = vcombine.high %v284_v51, %v284_v51 }
 0x102   :  { %v304_v41 = vrot.slane %v238_v36, %v1142_v11  ;;  %v312_v46 = vrot.slane %v235_v42, %v1142_v11  ;;  %v239_v47 = vcombine.high %v235_v42, %v235_v42  ;;  %v177_v19 = vadd.f32 %v1137_v9, %v850_v62  ;;  %v851_v62 = vld [vmem:[#allocation7] ss:$0 sm:$0xff] }
 0x103   :  { %357 = vrot.lane.b32.xlu1 %v300_v28, %s1059_s0  ;;  %v316_v48 = vrot.slane %v237_v44, %v1142_v11  ;;  %v348_v56 = vrot.slane %v286_v53, %v1142_v11  ;;  %v352_v57 = vrot.slane %v288_v55, %v1142_v11 }
 0x104   :  { %v320_v50 = vrot.slane %v239_v47, %v1142_v11  ;;  %v180_v11 = vcombine.high %v176_v0, %v176_v0 }
 0x105   :  { %373 = vrot.lane.b32.xlu0 %v332_v32, %s1059_s0  ;;  %v181_v32 = vcombine.high %v177_v19, %v177_v19 }
 0x107   :  { %375 = vrot.lane.b32.xlu1 %v336_v35, %s1059_s0 }
 0x109   :  { %355 = vrot.lane.b32.xlu0 %v296_v38, %s1059_s0 }
 0x10b   :  { %359 = vrot.lane.b32.xlu1 %v304_v41, %s1059_s0 }
 0x10d   :  { %361 = vrot.lane.b32.xlu0 %v308_v43, %s1059_s0 }
 0x10f   :  { %363 = vrot.lane.b32.xlu1 %v312_v46, %s1059_s0 }
 0x111   :  { %365 = vrot.lane.b32.xlu0 %v316_v48, %s1059_s0 }
 0x113   :  { %367 = vrot.lane.b32.xlu1 %v320_v50, %s1059_s0 }
 0x115   :  { %377 = vrot.lane.b32.xlu0 %v340_v52, %s1059_s0 }
 0x117   :  { %379 = vrot.lane.b32.xlu1 %v344_v54, %s1059_s0 }
 0x119   :  { %381 = vrot.lane.b32.xlu0 %v348_v56, %s1059_s0  ;;  %v624_v56 = vld [vmem:[%s1279_s5 + $0x18] sm:$0xff] }
 0x11b   :  { %383 = vrot.lane.b32.xlu1 %v352_v57, %s1059_s0  ;;  %v1060_v57 = vmov 0.0  }
 0x11c   :  { %914 = vmatprep.subr.mxu0 %v1060_v57  ;;  %922 = vmatprep.mubr.msk.f32.mxu0 %vm1061_vm3, %v1060_v57 }
 0x11d   :  { %915 = vmatpush3.msra.mxu0 %v624_v56  ;;  %v716_v56 = vld [vmem:[%s1281_s7 + $0x8] sm:$0xff] }
 0x11e   :  { %916 = vmatprep.subr.mxu0 %v1060_v57 }
 0x16f   :  { %v370_v58 = vpop.permute.xlu0 %369 }
 0x170   :  { %v409_v27 = vadd.f32 %v370_v58, %v177_v19  ;;  %v623_v58 = vld [vmem:[%s1279_s5 + $0x10] sm:$0xff] }
 0x171   :  { %v372_v59 = vpop.permute.xlu1 %371  ;;  %917 = vmatpush3.msra.mxu0 %v623_v58  ;;  %v715_v58 = vld [vmem:[%s1281_s7] sm:$0xff] }
 0x172   :  { %v410_v22 = vadd.f32 %v372_v59, %v177_v19  ;;  %v425_v38 = vmax.f32 %v409_v27, 0.0  ;;  %v622_v59 = vld [vmem:[%s1279_s5 + $0x8] sm:$0xff]  ;;  %918 = vmatprep.subr.mxu0 %v1060_v57 }
 0x173   :  { %v354_v60 = vpop.permute.xlu0 %353  ;;  %919 = vmatpush3.msra.mxu0 %v622_v59  ;;  %v860_v59 = vld [vmem:[#allocation8] ss:$0 sm:$0xff] }
 0x174   :  { %v401_v2 = vadd.f32 %v354_v60, %v176_v0  ;;  %v426_v33 = vmax.f32 %v410_v22, 0.0  ;;  %v621_v60 = vld [vmem:[%s1279_s5] sm:$0xff]  ;;  %920 = vmatprep.subr.mxu0 %v1060_v57 }
 0x175   :  { %v358_v61 = vpop.permute.xlu1 %357  ;;  %921 = vmatpush3.msra.mxu0 %v621_v60 }
 0x176   :  { %v403_v4 = vadd.f32 %v358_v61, %v176_v0  ;;  %v417_v8 = vmax.f32 %v401_v2, 0.0  ;;  %v459_v43 = vcombine.low %v425_v38, %v426_v33  ;;  %925 = vmatprep.subr.mxu0 %v1060_v57 }
 0x177   :  { %v374_v63 = vpop.permute.xlu0 %373 }
 0x178   :  { %v419_v15 = vmax.f32 %v403_v4, 0.0  ;;  %v411_v34 = vadd.f32 %v374_v63, %v177_v19 }
 0x179   :  { %v376_v1 = vpop.permute.xlu1 %375 }
 0x17a   :  { %v412_v29 = vadd.f32 %v376_v1, %v177_v19  ;;  %v427_v45 = vmax.f32 %v411_v34, 0.0 }
 0x17b   :  { %v356_v3 = vpop.permute.xlu0 %355 }
 0x17c   :  { %v402_v5 = vadd.f32 %v356_v3, %v176_v0  ;;  %v428_v40 = vmax.f32 %v412_v29, 0.0 }
 0x17d   :  { %v360_v6 = vpop.permute.xlu1 %359 }
 0x17e   :  { %v418_v10 = vmax.f32 %v402_v5, 0.0  ;;  %v404_v13 = vadd.f32 %v360_v6, %v176_v0  ;;  %v460_v50 = vcombine.low %v427_v45, %v428_v40 }
 0x17f   :  { %v362_v14 = vpop.permute.xlu0 %361 }
 0x180   :  { %v420_v16 = vmax.f32 %v404_v13, 0.0  ;;  %v405_v17 = vadd.f32 %v362_v14, %v180_v11  ;;  %v455_v18 = vcombine.low %v417_v8, %v418_v10 }
 0x181   :  { %v364_v20 = vpop.permute.xlu1 %363 }
 0x182   :  { %v456_v12 = vcombine.low %v419_v15, %v420_v16  ;;  %v406_v21 = vadd.f32 %v364_v20, %v180_v11  ;;  %902 = vmatprep.mubr.msk.f32.mxu1 %vm463_vm2, %v455_v18  ;;  %v421_v24 = vmax.f32 %v405_v17, 0.0 }
 0x183   :  { %v366_v23 = vpop.permute.xlu0 %365 }
 0x184   :  { %v422_v25 = vmax.f32 %v406_v21, 0.0  ;;  %v407_v26 = vadd.f32 %v366_v23, %v180_v11  ;;  %903 = vmatmul.mubr.msk.f32.vlgmr.msra.gmra.mxu1 %vm463_vm2, %v456_v12 }
 0x185   :  { %v368_v28 = vpop.permute.xlu1 %367 }
 0x186   :  { %v457_v30 = vcombine.low %v421_v24, %v422_v25  ;;  %v408_v31 = vadd.f32 %v368_v28, %v180_v11  ;;  %v423_v35 = vmax.f32 %v407_v26, 0.0 }
 0x187   :  { %v378_v9 = vpop.permute.xlu0 %377 }
 0x188   :  { %v424_v36 = vmax.f32 %v408_v31, 0.0  ;;  %v413_v37 = vadd.f32 %v378_v9, %v181_v32  ;;  %905 = vmatprep.mubr.msk.f32.mxu1 %vm463_vm2, %v457_v30 }
 0x189   :  { %v380_v39 = vpop.permute.xlu1 %379 }
 0x18a   :  { %v458_v41 = vcombine.low %v423_v35, %v424_v36  ;;  %v414_v42 = vadd.f32 %v380_v39, %v181_v32  ;;  %v429_v46 = vmax.f32 %v413_v37, 0.0 }
 0x18b   :  { %v382_v44 = vpop.permute.xlu0 %381 }
 0x18c   :  { %v430_v47 = vmax.f32 %v414_v42, 0.0  ;;  %v415_v48 = vadd.f32 %v382_v44, %v181_v32  ;;  %906 = vmatmul.mubr.msk.f32.gmra.mxu1 %vm463_vm2, %v458_v41 }
 0x18d   :  { %v384_v49 = vpop.permute.xlu1 %383  ;;  %908 = vmatprep.mubr.msk.f32.mxu1 %vm463_vm2, %v459_v43 }
 0x18e   :  { %v461_v51 = vcombine.low %v429_v46, %v430_v47  ;;  %v416_v52 = vadd.f32 %v384_v49, %v181_v32  ;;  %v431_v53 = vmax.f32 %v415_v48, 0.0 }
 0x190   :  { %v432_v54 = vmax.f32 %v416_v52, 0.0  ;;  %909 = vmatmul.mubr.msk.f32.gmra.mxu1 %vm463_vm2, %v460_v50 }
 0x191   :  { %911 = vmatprep.mubr.msk.f32.mxu1 %vm463_vm2, %v461_v51 }
 0x192   :  { %v462_v55 = vcombine.low %v431_v53, %v432_v54  ;;  %v718_v53 = vld [vmem:[%s1281_s7 + $0x18] sm:$0xff] }
 0x194   :  { %912 = vmatmul.mubr.msk.f32.gmra.mxu1 %vm463_vm2, %v462_v55  ;;  %v717_v55 = vld [vmem:[%s1281_s7 + $0x10] sm:$0xff]  ;;  %s1063_s7 = smov [#allocation10]  }
 0x244   :  { %v904_v61 = vpop.f32.mrf.mxu1 }
 0x245   :  { %v552_v0 = vadd.f32 %v904_v61, %v851_v62 }
 0x246   :  { %v546_v63 = vpop.f32.mrf.mxu1 }
 0x247   :  { %v547_v1 = vadd.f32 %v851_v62, %v546_v63  ;;  %v586_v3 = vsel %vm463_vm2, %v552_v0, -inf  ;;  %v1062_v0 = vmov 1983009808  }
 0x249   :  { %v585_v2 = vsel %vm463_vm2, %v547_v1, -inf  ;;  %v801_v1 = vunpack.c.l.s4 %v1062_v0 }
 0x24a   :  { %v587_v4 = vmax.f32 %v585_v2, %v586_v3  ;;  %v862_v3 = vld [vmem:[%s1282_s8] ss:$0 sm:$0xff]  ;;  %s836_s8 = sshll.u32 %s1063_s7, 4  ;;  %s837_s8 = int_to_ptr.vmem [resolvable:$true] %s836_s8 }
 0x24b   :  { %v802_v2 = vunpack.c.0.s8 %v801_v1  ;;  %s1026_s11 = scalar_lea.vmem %s837_s8, 32  ;;  %p1031_p7 = scmp.lt.s32.totalorder %s837_s8, %s837_s8 }
 0x24c   :  { %v907_v5 = vpop.f32.mrf.mxu1  ;;  %v588_v13 = vrot.slane %v587_v4, 4  ;;  %p1027_p6 = scmp.ne.s32.totalorder %s837_s8, %s1026_s11  ;;  %p1032_p8 = scmp.lt.s32.totalorder %s1026_s11, %s1026_s11 }
 0x24d   :  { %v562_v6 = vadd.f32 %v907_v5, %v851_v62 }
 0x24e   :  { %v556_v8 = vpop.f32.mrf.mxu1  ;;  %v589_v20 = vmax.f32 %v587_v4, %v588_v13  ;;  %v805_v4 = vsub.s32 %v802_v2, %v1132_v7  ;;  %p1033_p9 = por %p1032_p8, %p1031_p7 }
 0x24f   :  { %v557_v10 = vadd.f32 %v851_v62, %v556_v8  ;;  %v595_v14 = vsel %vm463_vm2, %v562_v6, -inf }
 0x250   :  { %v910_v11 = vpop.f32.mrf.mxu1  ;;  %v590_v29 = vrot.slane %v589_v20, 2  ;;  %p1034_p10 = pnand %p1033_p9, %p1027_p6 }
 0x251   :  { %v594_v15 = vsel %vm463_vm2, %v557_v10, -inf  ;;  %v572_v16 = vadd.f32 %v910_v11, %v851_v62 }
 0x252   :  { %v596_v17 = vmax.f32 %v594_v15, %v595_v14  ;;  %v566_v18 = vpop.f32.mrf.mxu1  ;;  %v591_v36 = vmax.f32 %v589_v20, %v590_v29 }
 0x253   :  { %v567_v19 = vadd.f32 %v851_v62, %v566_v18  ;;  %v604_v22 = vsel %vm463_vm2, %v572_v16, -inf }
 0x254   :  { %v597_v12 = vrot.slane %v596_v17, 4  ;;  %v913_v21 = vpop.f32.mrf.mxu1  ;;  %v592_v42 = vrot.slane %v591_v36, 1 }
 0x255   :  { %v603_v23 = vsel %vm463_vm2, %v567_v19, -inf  ;;  %v582_v24 = vadd.f32 %v913_v21, %v851_v62 }
 0x256   :  { %v598_v25 = vmax.f32 %v596_v17, %v597_v12  ;;  %v605_v26 = vmax.f32 %v603_v23, %v604_v22  ;;  %v576_v27 = vpop.f32.mrf.mxu1  ;;  %v593_v48 = vmax.f32 %v591_v36, %v592_v42 }
 0x257   :  { %v577_v28 = vadd.f32 %v851_v62, %v576_v27  ;;  %v613_v32 = vsel %vm463_vm2, %v582_v24, -inf }
 0x258   :  { %v599_v30 = vrot.slane %v598_v25, 2  ;;  %v606_v31 = vrot.slane %v605_v26, 4 }
 0x259   :  { %v612_v33 = vsel %vm463_vm2, %v577_v28, -inf }
 0x25a   :  { %v600_v9 = vmax.f32 %v598_v25, %v599_v30  ;;  %v607_v34 = vmax.f32 %v605_v26, %v606_v31  ;;  %v614_v35 = vmax.f32 %v612_v33, %v613_v32 }
 0x25c   :  { %v608_v37 = vrot.slane %v607_v34, 2  ;;  %v615_v38 = vrot.slane %v614_v35, 4  ;;  %v601_v39 = vrot.slane %v600_v9, 1 }
 0x25e   :  { %v609_v40 = vmax.f32 %v607_v34, %v608_v37  ;;  %v616_v41 = vmax.f32 %v614_v35, %v615_v38  ;;  %v602_v45 = vmax.f32 %v600_v9, %v601_v39 }
 0x260   :  { %v610_v43 = vrot.slane %v609_v40, 1  ;;  %v617_v44 = vrot.slane %v616_v41, 2  ;;  %v637_v51 = vsel %vm636_vm4, %v602_v45, %v593_v48 }
 0x262   :  { %v618_v46 = vmax.f32 %v616_v41, %v617_v44  ;;  %v611_v47 = vmax.f32 %v609_v40, %v610_v43 }
 0x264   :  { %v619_v49 = vrot.slane %v618_v46, 1  ;;  %v639_v52 = vsel %vm638_vm5, %v611_v47, %v637_v51 }
 0x266   :  { %v620_v50 = vmax.f32 %v618_v46, %v619_v49 }
 0x268   :  { %v641_v54 = vsel %vm640_vm6, %v620_v50, %v639_v52 }
 0x269   :  { %923 = vmatmul.mubr.msk.f32.vlgmr.msra.gmra.mxu0 %vm463_vm2, %v641_v54 }
 0x26a   :  { %926 = vmatpush3.msra.mxu0 %v718_v53  ;;  %933 = vmatprep.mubr.msk.f32.mxu0 %vm1061_vm3, %v1060_v57 }
 0x26b   :  { %927 = vmatprep.subr.mxu0 %v1060_v57 }
 0x26c   :  { %928 = vmatpush3.msra.mxu0 %v717_v55 }
 0x26d   :  { %929 = vmatprep.subr.mxu0 %v1060_v57 }
 0x26e   :  { %930 = vmatpush3.msra.mxu0 %v716_v56 }
 0x26f   :  { %931 = vmatprep.subr.mxu0 %v1060_v57 }
 0x270   :  { %932 = vmatpush3.msra.mxu0 %v715_v58 }
 0x329   :  { %v710_v60 = vpop.f32.mrf.mxu0 }
 0x32a   :  { %v711_v61 = vadd.f32 %v860_v59, %v710_v60 }
 0x32b   :  { %v924_v62 = vpop.f32.mrf.mxu0 }
 0x32c   :  { %v714_v63 = vmax.f32 %v711_v61, 0.0 }
 0x32e   :  { %934 = vmatmul.mubr.msk.f32.vlgmr.msra.gmra.mxu0 %vm463_vm2, %v714_v63 }
 0x3ee   :  { %v795_v5 = vpop.f32.mrf.mxu0 }
 0x3ef   :  { %v796_v6 = vadd.f32 %v862_v3, %v795_v5 }
 0x3f0   :  { %v935_v57 = vpop.f32.mrf.mxu0 }
 0x3f1   :  { %v806_v8 = vrot.slane %v796_v6, %v805_v4 }
 0x3f3   :  { %v807_v10 = vcombine.high %v806_v8, %v806_v8  ;;  %v811_v13 = vsel %vm810_vm7, %v806_v8, -inf }
 0x3f4   :  { %v812_v11 = vrot.slane %v811_v13, 4 }
 0x3f5   :  { %v818_v14 = vsel %vm810_vm7, %v807_v10, -inf }
 0x3f6   :  { %v813_v15 = vmax.f32 %v811_v13, %v812_v11  ;;  %v819_v16 = vrot.slane %v818_v14, 4 }
 0x3f8   :  { %v814_v17 = vrot.slane %v813_v15, 2  ;;  %v820_v18 = vmax.f32 %v818_v14, %v819_v16 }
 0x3fa   :  { %v815_v19 = vmax.f32 %v813_v15, %v814_v17  ;;  %v821_v20 = vrot.slane %v820_v18, 2 }
 0x3fc   :  { %v816_v12 = vrot.slane %v815_v19, 1  ;;  %v822_v21 = vmax.f32 %v820_v18, %v821_v20 }
 0x3fe   :  { %v823_v7 = vrot.slane %v822_v21, 1  ;;  %v817_v22 = vmax.f32 %v815_v19, %v816_v12 }
 0x400   :  { %v824_v23 = vmax.f32 %v822_v21, %v823_v7 }
 0x402   :  { %v827_v24 = vsel %vm636_vm4, %v824_v23, %v817_v22 }
 0x403   :  { %829 = vst.msk [vmem:[#allocation10] sm:$0x3] %vm810_vm7, %v827_v24 }
 0x404   :  { %1037 = shalt.err (!%p1034_p10)
}
 0x405   :  { %839 = dma.vmem_to_hbm [thread:$0]  %s837_s8, 32, %s1283_s9, [#allocation4]  }
 0x406   :  { %1052 = dma.done.wait [#allocation4], 32  }
 0x407   :  { %1053 = vsyncadd [#allocation4], 4294967264 }
 0x408   :  { %843 = vsyncpa [#allocation3], 1 }
 0x409   :  { %844 = vsyncpa [#allocation6], 1 }
 0x40a   :  { %845 = vsyncpa [#allocation9], 1 }
 0x40b   :  { %846 = vsyncpa [#allocation4], 1 }

</bundles_post_ra>
